<compile_context>
chip_gen: v7x
topology: tpu7x:2x2x1
jax: 0.10.0
libtpu: 0.0.40
codegen_flags: <defaults>
</compile_context>

<pallas_src>
import functools

import jax
import jax.numpy as jnp
from jax.experimental import pallas as pl
from jax.experimental.pallas import tpu as pltpu

D_IN, D_H1, D_H2, D_OUT = 768, 512, 256, 256


def _cdiv(a, b):
    return -(-a // b)


def _round_up(x, m):
    return _cdiv(x, m) * m


def mlp_kernel(x_ref, w1_ref, b1_ref, w2_ref, b2_ref, w3_ref, b3_ref, o_ref):
    # fc1 + ReLU  (bf16 MXU operands, f32 accumulation, f32 epilogue)
    x = x_ref[...].astype(jnp.bfloat16)        # no-op if the caller supplies bf16
    h1 = jnp.dot(x, w1_ref[...], preferred_element_type=jnp.float32)
    h1 = jnp.maximum(h1 + b1_ref[...], 0.0)
    # fc2 + ReLU
    h2 = jnp.dot(h1.astype(jnp.bfloat16), w2_ref[...],
                 preferred_element_type=jnp.float32)
    h2 = jnp.maximum(h2 + b2_ref[...], 0.0)
    # fc3 (no activation)
    out = jnp.dot(h2.astype(jnp.bfloat16), w3_ref[...],
                  preferred_element_type=jnp.float32)
    o_ref[...] = (out + b3_ref[...]).astype(o_ref.dtype)


def _pick_tb(B, tb_max):
    """Balanced batch tile.

    - Waste is bounded (~8 rows of padding per step) instead of padding B up to a
      multiple of a fixed large tile.
    - Step count is even and >= 2 so v7x's two TensorCores both get work under
      dimension_semantics=("parallel",).
    - Tile is capped at tb_max (VMEM budget; 2048 fits v7x's 64 MiB).
    """
    B8 = _round_up(max(B, 1), 8)
    if B8 <= 8:
        return 8
    n_steps = max(2, _cdiv(B8, tb_max))
    if n_steps % 2:
        n_steps += 1
    tb = _round_up(_cdiv(B8, n_steps), 8)
    return min(tb, tb_max)


@functools.partial(jax.jit, static_argnames=("tb_max",))
def mlp_f1_forward(x, params, *, tb_max=2048):
    """x: (B, 768) f32 or bf16 -> (B, 256) in x.dtype (matches x.view(-1, 256))."""
    w1, b1, w2, b2, w3, b3 = params
    B = x.shape[0]

    tb = _pick_tb(B, tb_max)
    Bp = _round_up(B, tb)
    if Bp != B:
        x = jnp.pad(x, ((0, Bp - B), (0, 0)))

    grid = (Bp // tb,)

    act_in_bytes = Bp * D_IN * x.dtype.itemsize
    act_out_bytes = Bp * D_OUT * x.dtype.itemsize
    weight_bytes = 2 * (D_IN * D_H1 + D_H1 * D_H2 + D_H2 * D_OUT)   # bf16 weights
    bias_bytes = 4 * (D_H1 + D_H2 + D_OUT)
    flops = 2 * Bp * (D_IN * D_H1 + D_H1 * D_H2 + D_H2 * D_OUT)

    out = pl.pallas_call(
        mlp_kernel,
        out_shape=jax.ShapeDtypeStruct((Bp, D_OUT), x.dtype),
        grid_spec=pltpu.PrefetchScalarGridSpec(
            num_scalar_prefetch=0,
            grid=grid,
            in_specs=[
                pl.BlockSpec((tb, D_IN), lambda i: (i, 0)),     # x tile
                pl.BlockSpec((D_IN, D_H1), lambda i: (0, 0)),   # w1 (resident)
                pl.BlockSpec((1, D_H1), lambda i: (0, 0)),      # b1
                pl.BlockSpec((D_H1, D_H2), lambda i: (0, 0)),   # w2
                pl.BlockSpec((1, D_H2), lambda i: (0, 0)),      # b2
                pl.BlockSpec((D_H2, D_OUT), lambda i: (0, 0)),  # w3
                pl.BlockSpec((1, D_OUT), lambda i: (0, 0)),     # b3
            ],
            out_specs=pl.BlockSpec((tb, D_OUT), lambda i: (i, 0)),
        ),
        compiler_params=pltpu.CompilerParams(
            dimension_semantics=("parallel",),
            # ~36 MiB peak at tb=2048 (f32 activations) + headroom; < v7x's 64 MiB.
            vmem_limit_bytes=48 * 1024 * 1024,
        ),
        cost_estimate=pl.CostEstimate(
            flops=flops,
            transcendentals=0,
            bytes_accessed=act_in_bytes + weight_bytes + bias_bytes + act_out_bytes,
        ),
    )(x, w1, b1, w2, b2, w3, b3)

    # forward() ends with x.view(-1, 256); strip the batch padding.
    return out[:B].reshape(-1, D_OUT)


def init_params(key):
    """Deterministic init mirroring nn.Linear default (uniform +/- 1/sqrt(fan_in)).
    Weights are created as (in, out) = transpose of PyTorch's (out, in) and stored
    in bf16 (MXU operand dtype); biases stay f32 for the f32 epilogue."""
    ks = jax.random.split(key, 6)

    def lin(kw, kb, fan_in, fan_out):
        bound = 1.0 / jnp.sqrt(fan_in)
        w = jax.random.uniform(kw, (fan_in, fan_out), jnp.float32, -bound, bound)
        b = jax.random.uniform(kb, (1, fan_out), jnp.float32, -bound, bound)
        return w.astype(jnp.bfloat16), b

    w1, b1 = lin(ks[0], ks[1], D_IN, D_H1)
    w2, b2 = lin(ks[2], ks[3], D_H1, D_H2)
    w3, b3 = lin(ks[4], ks[5], D_H2, D_OUT)
    return (w1, b1, w2, b2, w3, b3)


def reference_bf16(x, params):
    """Pure-JAX reference mirroring the kernel's numerics (bf16 operands, f32 acc)."""
    w1, b1, w2, b2, w3, b3 = params
    h1 = jnp.dot(x.astype(jnp.bfloat16), w1, preferred_element_type=jnp.float32)
    h1 = jnp.maximum(h1 + b1, 0.0)
    h2 = jnp.dot(h1.astype(jnp.bfloat16), w2, preferred_element_type=jnp.float32)
    h2 = jnp.maximum(h2 + b2, 0.0)
    out = jnp.dot(h2.astype(jnp.bfloat16), w3, preferred_element_type=jnp.float32)
    return (out + b3).reshape(-1, D_OUT)


def reference_fp32(x, params):
    """Full-fp32 reference (matches the PyTorch module's math up to bf16 weight error)."""
    w1, b1, w2, b2, w3, b3 = params
    h1 = jnp.maximum(x.astype(jnp.float32) @ w1.astype(jnp.float32) + b1, 0.0)
    h2 = jnp.maximum(h1 @ w2.astype(jnp.float32) + b2, 0.0)
    return (h2 @ w3.astype(jnp.float32) + b3).reshape(-1, D_OUT)


if __name__ == "__main__":
    key = jax.random.PRNGKey(0)
    kx, kp = jax.random.split(key)
    params = init_params(kp)

    # Small smoke test: B=96 -> balanced tiles of 48 rows, a 2-step parallel grid
    # (so both TensorCores on v7x get work).
    B = 96
    x = jax.random.normal(kx, (B, D_IN), jnp.float32)
    out = jax.block_until_ready(mlp_f1_forward(x, params))
    assert out.shape == (B, D_OUT) and out.dtype == jnp.float32

    ref = reference_bf16(x, params)
    assert jnp.allclose(out, ref, atol=1e-2, rtol=1e-2), "mismatch vs bf16 reference"
    # Loose sanity check against the true fp32 math (bf16 weight/operand error only).
    ref32 = reference_fp32(x, params)
    assert jnp.allclose(out, ref32, atol=1e-1, rtol=1e-1), "drift vs fp32 reference"

    # Awkward / tiny batch: exercises balanced tiling + padding branch (B=13 -> Bp=16).
    out_small = jax.block_until_ready(mlp_f1_forward(x[:13], params))
    assert out_small.shape == (13, D_OUT)
    assert jnp.allclose(out_small, ref[:13], atol=1e-2, rtol=1e-2)

    # bf16 activations end-to-end (halves HBM traffic on the memory-bound v6e/v7x path).
    x_bf16 = x[:64].astype(jnp.bfloat16)
    out_bf16 = jax.block_until_ready(mlp_f1_forward(x_bf16, params))
    assert out_bf16.shape == (64, D_OUT) and out_bf16.dtype == jnp.bfloat16
    assert jnp.allclose(out_bf16.astype(jnp.float32), ref[:64], atol=3e-2, rtol=3e-2)

    print("KERNEL_OK")
</pallas_src>

<mosaic_0001>
module attributes {stable_mosaic.version = 11 : i64} {
  func.func @mlp_kernel(%arg0: i32, %arg1: memref<48x768xf32, #tpu.memory_space<vmem>>, %arg2: memref<768x512xbf16, #tpu.memory_space<vmem>>, %arg3: memref<1x512xf32, #tpu.memory_space<vmem>>, %arg4: memref<512x256xbf16, #tpu.memory_space<vmem>>, %arg5: memref<1x256xf32, #tpu.memory_space<vmem>>, %arg6: memref<256x256xbf16, #tpu.memory_space<vmem>>, %arg7: memref<1x256xf32, #tpu.memory_space<vmem>>, %arg8: memref<48x256xf32, #tpu.memory_space<vmem>>) attributes {dimension_semantics = [#tpu.dimension_semantics<parallel>], iteration_bounds = array<i64: 2>, scalar_prefetch = 0 : i64, scratch_operands = 0 : i64, tpu.core_type = #tpu.core_type<tc>, window_params = [{transform_indices = @transform_0, window_bounds = array<i64: 48, 768>}, {pipeline_mode = #tpu.pipeline_mode<synchronous>, transform_indices = @transform_1, window_bounds = array<i64: 768, 512>}, {pipeline_mode = #tpu.pipeline_mode<synchronous>, transform_indices = @transform_2, window_bounds = array<i64: 1, 512>}, {pipeline_mode = #tpu.pipeline_mode<synchronous>, transform_indices = @transform_3, window_bounds = array<i64: 512, 256>}, {pipeline_mode = #tpu.pipeline_mode<synchronous>, transform_indices = @transform_4, window_bounds = array<i64: 1, 256>}, {pipeline_mode = #tpu.pipeline_mode<synchronous>, transform_indices = @transform_5, window_bounds = array<i64: 256, 256>}, {pipeline_mode = #tpu.pipeline_mode<synchronous>, transform_indices = @transform_6, window_bounds = array<i64: 1, 256>}, {transform_indices = @transform_7, window_bounds = array<i64: 48, 256>}]} {
    %c0 = arith.constant 0 : index
    %c0_0 = arith.constant 0 : index
    %0 = vector.load %arg1[%c0, %c0_0] : memref<48x768xf32, #tpu.memory_space<vmem>>, vector<48x768xf32>
    %1 = arith.truncf %0 : vector<48x768xf32> to vector<48x768xbf16>
    %c0_1 = arith.constant 0 : index
    %c0_2 = arith.constant 0 : index
    %2 = vector.load %arg2[%c0_1, %c0_2] : memref<768x512xbf16, #tpu.memory_space<vmem>>, vector<768x512xbf16>
    %cst = arith.constant dense<0.000000e+00> : vector<48x512xf32>
    %3 = tpu.matmul %1, %2, %cst {dimension_numbers = #tpu.dot_dimension_numbers<[1], [0], [0], [1], [0, 0, 1, 1], [], []>} : vector<48x768xbf16>, vector<768x512xbf16>, vector<48x512xf32> -> vector<48x512xf32>
    %c0_3 = arith.constant 0 : index
    %c0_4 = arith.constant 0 : index
    %4 = vector.load %arg3[%c0_3, %c0_4] : memref<1x512xf32, #tpu.memory_space<vmem>>, vector<1x512xf32>
    %5 = vector.broadcast %4 : vector<1x512xf32> to vector<48x512xf32>
    %6 = arith.addf %3, %5 : vector<48x512xf32>
    %cst_5 = arith.constant 0.000000e+00 : f32
    %7 = vector.broadcast %cst_5 : f32 to vector<48x512xf32>
    %8 = arith.maximumf %6, %7 : vector<48x512xf32>
    %9 = arith.truncf %8 : vector<48x512xf32> to vector<48x512xbf16>
    %c0_6 = arith.constant 0 : index
    %c0_7 = arith.constant 0 : index
    %10 = vector.load %arg4[%c0_6, %c0_7] : memref<512x256xbf16, #tpu.memory_space<vmem>>, vector<512x256xbf16>
    %cst_8 = arith.constant dense<0.000000e+00> : vector<48x256xf32>
    %11 = tpu.matmul %9, %10, %cst_8 {dimension_numbers = #tpu.dot_dimension_numbers<[1], [0], [0], [1], [0, 0, 1, 1], [], []>} : vector<48x512xbf16>, vector<512x256xbf16>, vector<48x256xf32> -> vector<48x256xf32>
    %c0_9 = arith.constant 0 : index
    %c0_10 = arith.constant 0 : index
    %12 = vector.load %arg5[%c0_9, %c0_10] : memref<1x256xf32, #tpu.memory_space<vmem>>, vector<1x256xf32>
    %13 = vector.broadcast %12 : vector<1x256xf32> to vector<48x256xf32>
    %14 = arith.addf %11, %13 : vector<48x256xf32>
    %cst_11 = arith.constant 0.000000e+00 : f32
    %15 = vector.broadcast %cst_11 : f32 to vector<48x256xf32>
    %16 = arith.maximumf %14, %15 : vector<48x256xf32>
    %17 = arith.truncf %16 : vector<48x256xf32> to vector<48x256xbf16>
    %c0_12 = arith.constant 0 : index
    %c0_13 = arith.constant 0 : index
    %18 = vector.load %arg6[%c0_12, %c0_13] : memref<256x256xbf16, #tpu.memory_space<vmem>>, vector<256x256xbf16>
    %cst_14 = arith.constant dense<0.000000e+00> : vector<48x256xf32>
    %19 = tpu.matmul %17, %18, %cst_14 {dimension_numbers = #tpu.dot_dimension_numbers<[1], [0], [0], [1], [0, 0, 1, 1], [], []>} : vector<48x256xbf16>, vector<256x256xbf16>, vector<48x256xf32> -> vector<48x256xf32>
    %c0_15 = arith.constant 0 : index
    %c0_16 = arith.constant 0 : index
    %20 = vector.load %arg7[%c0_15, %c0_16] : memref<1x256xf32, #tpu.memory_space<vmem>>, vector<1x256xf32>
    %21 = vector.broadcast %20 : vector<1x256xf32> to vector<48x256xf32>
    %22 = arith.addf %19, %21 : vector<48x256xf32>
    %c0_17 = arith.constant 0 : index
    %c0_18 = arith.constant 0 : index
    %23 = vector.load %arg8[%c0_17, %c0_18] : memref<48x256xf32, #tpu.memory_space<vmem>>, vector<48x256xf32>
    tpu.vector_store %arg8[%c0_17, %c0_18], %22 {strides = array<i32>} : memref<48x256xf32, #tpu.memory_space<vmem>>, vector<48x256xf32>,
    return
  }
  func.func @transform_0(%arg0: i32) -> (i32, i32) {
    %c0_i32 = arith.constant 0 : i32
    %c0_i32_0 = arith.constant 0 : i32
    return %arg0, %c0_i32 : i32, i32
  }
  func.func @transform_1(%arg0: i32) -> (i32, i32) {
    %c0_i32 = arith.constant 0 : i32
    %c0_i32_0 = arith.constant 0 : i32
    %c0_i32_1 = arith.constant 0 : i32
    return %c0_i32, %c0_i32_0 : i32, i32
  }
  func.func @transform_2(%arg0: i32) -> (i32, i32) {
    %c0_i32 = arith.constant 0 : i32
    %c0_i32_0 = arith.constant 0 : i32
    %c0_i32_1 = arith.constant 0 : i32
    return %c0_i32, %c0_i32_0 : i32, i32
  }
  func.func @transform_3(%arg0: i32) -> (i32, i32) {
    %c0_i32 = arith.constant 0 : i32
    %c0_i32_0 = arith.constant 0 : i32
    %c0_i32_1 = arith.constant 0 : i32
    return %c0_i32, %c0_i32_0 : i32, i32
  }
  func.func @transform_4(%arg0: i32) -> (i32, i32) {
    %c0_i32 = arith.constant 0 : i32
    %c0_i32_0 = arith.constant 0 : i32
    %c0_i32_1 = arith.constant 0 : i32
    return %c0_i32, %c0_i32_0 : i32, i32
  }
  func.func @transform_5(%arg0: i32) -> (i32, i32) {
    %c0_i32 = arith.constant 0 : i32
    %c0_i32_0 = arith.constant 0 : i32
    %c0_i32_1 = arith.constant 0 : i32
    return %c0_i32, %c0_i32_0 : i32, i32
  }
  func.func @transform_6(%arg0: i32) -> (i32, i32) {
    %c0_i32 = arith.constant 0 : i32
    %c0_i32_0 = arith.constant 0 : i32
    %c0_i32_1 = arith.constant 0 : i32
    return %c0_i32, %c0_i32_0 : i32, i32
  }
  func.func @transform_7(%arg0: i32) -> (i32, i32) {
    %c0_i32 = arith.constant 0 : i32
    %c0_i32_0 = arith.constant 0 : i32
    return %arg0, %c0_i32 : i32, i32
  }
}

</mosaic_0001>

<bundles_post_ra>
// kernel: mlp_f1_forward.1
= control target key start
LH: loop header
LB: loop body
LE: loop exit
PB: predicated region body
PF: predicated region fallthrough
CT: control target
= control target key end

     0   :  { %s4462_s0 = inlined_call_operand.hbm [shape: f32[96,768], index: 0, kind: input, shape index: {}]   ;;  %s4463_s1 = inlined_call_operand.hbm [shape: bf16[768,512], index: 1, kind: input, shape index: {}]   ;;  %s4464_s2 = inlined_call_operand.vmem [shape: f32[1,512], index: 2, kind: input, shape index: {}]   ;;  %s4465_s3 = inlined_call_operand.hbm [shape: bf16[512,256], index: 3, kind: input, shape index: {}]   ;;  %s4466_s4 = inlined_call_operand.vmem [shape: f32[1,256], index: 4, kind: input, shape index: {}]   ;;  %s4467_s5 = inlined_call_operand.hbm [shape: bf16[256,256], index: 5, kind: input, shape index: {}]   ;;  %s4468_s6 = inlined_call_operand.vmem [shape: f32[1,256], index: 6, kind: input, shape index: {}]   ;;  %s4469_s7 = inlined_call_operand.hbm [shape: f32[96,256], index: 7, kind: output, shape index: {}]  }
   0x1   :  { %4473 = sst [smem:[#allocation15_spill]] %s4463_s1 }
   0x2   :  { %12 = vsyncpa [#allocation3], 0 }
   0x3   :  { %14 = vsyncpa [#allocation3 + $0x1], 0 }
   0x4   :  { %15 = vsyncpa [#allocation6], 0 }
   0x5   :  { %16 = vsyncpa [#allocation9], 0 }
   0x6   :  { %17 = vsyncpa [#allocation4], 0 }
   0x7   :  { %19 = vsyncpa [#allocation4 + $0x1], 0  ;;  %s4089_s24 = smov 0   ;;  %s4091_s25 = smov 0  }
   0x8   :  { %s4093_s26 = smov 0   ;;  %s4095_s27 = smov 0  }
   0x9 LB: > { %s4110_s28 = sadd.s32 4294967295, %s4034_s27   ;;  %s2922_s29 = sadd.s32 4294967294, %s4034_s27   ;;  %s4034_s27 = sphi %s4095_s27, %s4494_s27   ;;  %s4030_s26 = sphi %s4093_s26, %s4493_s26   ;;  %s4026_s25 = sphi %s4091_s25, %s4492_s25   ;;  %s4022_s24 = sphi %s4089_s24, %s4491_s24  }
   0xa   : > { %p45_p0 = scmp.ne.s32.totalorder %s4026_s25, %s4022_s24  ;;  %p4470_p1 = scmp.eq.s32.totalorder %s4110_s28, 0 }
   0xb   : > { %p201_p3 = scmp.eq.s32.totalorder %s2922_s29, 1  ;;  %p2923_p5 = scmp.ge.s32.totalorder %s4034_s27, 1 }
   0xc   : > { %p4119_p4 = por %p4470_p1, %p45_p0  ;;  %p208_p7 = scmp.lt.s32.totalorder %s4034_s27, 3 }
   0xd   : > { %p4124_p6 = por %p201_p3, %p45_p0  ;;  %s4036_s10 = smov [#allocation5]  }
   0xe   : > { %s4474_s30 = scalar_select %p4119_p4, 1, 0 }
   0xf   : > { %s4475_s8 = scalar_select %p4124_p6, 1, 0 }
  0x10   : > { %p4129_p8 = pnand %p2923_p5, %p208_p7  ;;  %s220_s11 = sshll.u32 %s4036_s10, 4  ;;  %s4133_s11 = int_to_ptr.vmem [resolvable:$true] %s220_s11 }
  0x11   : > { %s4037_s13 = smov [#allocation7]   ;;  %s4478_s1 = sld [smem:[#allocation15_spill]] }
  0x12   : > { %s4476_s9 = scalar_select %p4129_p8, 1, 0 }
  0x13   : > { %p3344_p9 = pneg %p4129_p8  ;;  %s236_s14 = sshll.u32 %s4037_s13, 4  ;;  %s4144_s14 = int_to_ptr.vmem [resolvable:$true] %s236_s14 }
  0x15   : > { %p4140_p11 = pnand %p3344_p9, %p4470_p1 }
  0x17   : > { %s3846_s17 = scalar_lea.hbm %s4478_s1, 24576  ;;  %p4154_p13 = pneg %p4140_p11 }
  0x18   : > { %p3847_p12 = scmp.ne.s32.totalorder %s4478_s1, %s3846_s17  ;;  %p3853_p5 = scmp.lt.u32.totalorder %s3846_s17, %s4478_s1 }
  0x1a   : > { %p3849_p0 = pnand %p4154_p13, %p3847_p12 }
  0x1c   : > { %p3850_p3 = pneg %p3849_p0 }
  0x1e   : > { %p3855_p7 = pnand %p3853_p5, %p3850_p3 }
  0x20   : > { %3858 = shalt.err (!%p3855_p7)
}
  0x21   : > { %s3859_s23 = scalar_lea.vmem %s4133_s11, 24576  ;;  %p3867_p2 = scmp.lt.s32.totalorder %s4133_s11, %s4133_s11 }
  0x22   : > { %p3860_p9 = scmp.ne.s32.totalorder %s4133_s11, %s3859_s23  ;;  %p3868_p6 = scmp.lt.s32.totalorder %s3859_s23, %s3859_s23 }
  0x24   : > { %p3862_p10 = pnand %p3860_p9, %p4154_p13  ;;  %p3869_p12 = por %p3868_p6, %p3867_p2 }
  0x26   : > { %p3863_p1 = pneg %p3862_p10 }
  0x28   : > { %p3870_p0 = pnand %p3869_p12, %p3863_p1 }
  0x2a   : > { %3873 = shalt.err (!%p3870_p0)
}
  0x2b   : > { %s4038_s29 = smov 256   ;;  %s4039_s10 = smov 16  }
  0x2c   : > { %3347 = dma.hbm_to_vmem [thread:$0]  (!%p4140_p11), %s4478_s1, 24576, %s4133_s11, [#allocation6], %s4038_s29, %s4038_s29, %s4039_s10  }
  0x2d   : > { %s3874_s18 = scalar_lea.hbm %s4465_s3, 8192 }
  0x2e   : > { %p3875_p2 = scmp.ne.s32.totalorder %s4465_s3, %s3874_s18  ;;  %p3881_p10 = scmp.lt.u32.totalorder %s3874_s18, %s4465_s3 }
  0x30   : > { %p3877_p1 = pnand %p3875_p2, %p4154_p13 }
  0x32   : > { %p3878_p6 = pneg %p3877_p1 }
  0x34   : > { %p3883_p3 = pnand %p3881_p10, %p3878_p6 }
  0x36   : > { %3886 = shalt.err (!%p3883_p3)
}
  0x37   : > { %s3887_s11 = scalar_lea.vmem %s4144_s14, 8192  ;;  %p3895_p12 = scmp.lt.s32.totalorder %s4144_s14, %s4144_s14 }
  0x38   : > { %p3888_p5 = scmp.ne.s32.totalorder %s4144_s14, %s3887_s11  ;;  %p3896_p0 = scmp.lt.s32.totalorder %s3887_s11, %s3887_s11 }
  0x3a   : > { %p3890_p7 = pnand %p3888_p5, %p4154_p13  ;;  %p3897_p2 = por %p3896_p0, %p3895_p12 }
  0x3c   : > { %p3891_p9 = pneg %p3890_p7 }
  0x3e   : > { %p3898_p1 = pnand %p3897_p2, %p3891_p9 }
  0x40   : > { %3901 = shalt.err (!%p3898_p1)
}
  0x41   : > { %s4040_s29 = smov 128   ;;  %s4041_s10 = smov 8  }
  0x42   : > { %3350 = dma.hbm_to_vmem [thread:$0]  (!%p4140_p11), %s4465_s3, 8192, %s4144_s14, [#allocation6], %s4040_s29, %s4040_s29, %s4041_s10  }
  0x43   : > { %s4042_s16 = smov [#allocation8]   ;;  %s3902_s21 = scalar_lea.hbm %s4467_s5, 4096 }
  0x44   : > { %s252_s17 = sshll.u32 %s4042_s16, 4  ;;  %p3903_p6 = scmp.ne.s32.totalorder %s4467_s5, %s3902_s21  ;;  %s253_s17 = int_to_ptr.vmem [resolvable:$true] %s252_s17 }
  0x45   : > { %p3909_p5 = scmp.lt.u32.totalorder %s3902_s21, %s4467_s5 }
  0x46   : > { %p3905_p10 = pnand %p3903_p6, %p4154_p13 }
  0x48   : > { %p3906_p3 = pneg %p3905_p10 }
  0x4a   : > { %p3911_p7 = pnand %p3909_p5, %p3906_p3 }
  0x4c   : > { %3914 = shalt.err (!%p3911_p7)
}
  0x4d   : > { %s3915_s14 = scalar_lea.vmem %s253_s17, 4096  ;;  %p3923_p2 = scmp.lt.s32.totalorder %s253_s17, %s253_s17 }
  0x4e   : > { %p3916_p9 = scmp.ne.s32.totalorder %s253_s17, %s3915_s14  ;;  %p3924_p1 = scmp.lt.s32.totalorder %s3915_s14, %s3915_s14 }
  0x50   : > { %p3918_p12 = pnand %p3916_p9, %p4154_p13  ;;  %p3925_p4 = por %p3924_p1, %p3923_p2 }
  0x52   : > { %p3919_p0 = pneg %p3918_p12 }
  0x54   : > { %p3926_p8 = pnand %p3925_p4, %p3919_p0 }
  0x56   : > { %3929 = shalt.err (!%p3926_p8)
}
  0x57   : > { %3353 = dma.hbm_to_vmem [thread:$0]  (!%p4140_p11), %s4467_s5, 4096, %s253_s17, [#allocation9], %s4040_s29, %s4040_s29, %s4041_s10  }
  0x58   : > { %s4217_s1 = sadd.s32 1, %s4034_s27   ;;  %s32_s20 = sadd.s32 1, %s4030_s26 }
  0x59   : > { %s29_s12 = ssub.s32 %s4034_s27, %s4217_s1  ;;  %p39_p4 = scmp.ne.s32.totalorder %s4030_s26, %s4026_s25 }
  0x5a   : > { %p30_p8 = scmp.eq.s32.totalorder %s29_s12, 0  ;;  %p40_p13 = scmp.eq.s32.totalorder %s4034_s27, 0 }
  0x5b   : > { %p4480_p6 = scmp.eq.s32.totalorder %s4110_s28, 1  ;;  %p3365_p3 = scmp.lt.s32.totalorder %s4034_s27, 2 }
  0x5c   : > { %s4233_s18 = scalar_select %p30_p8, %s4030_s26, %s32_s20  }
  0x5d   : > { %p4227_p10 = por %p4480_p6, %p39_p4  ;;  %p41_p5 = por %p40_p13, %p39_p4 }
  0x5e   : > { %s269_s19 = sand.u32 1, %s4030_s26   ;;  %s3366_s29 = smul.u32 4608, %s4034_s27 }
  0x5f   : > { %s3324_s21 = smul.u32 288, %s269_s19  ;;  %p4237_p11 = pnand %p3365_p3, %p41_p5 }
  0x60   : > { %s4244_s23 = scalar_lea.hbm %s4462_s0, %s3366_s29  ;;  %s4248_s13 = scalar_lea.sflag [#allocation3], %s269_s19 }
  0x61   : > { %s273_s11 = scalar_lea.vmem [#allocation2], %s3324_s21  ;;  %s3930_s15 = scalar_lea.hbm %s4244_s23, 4608 }
  0x62   : > { %s281_s14 = sshll.u32 %s273_s11, 4  ;;  %p3931_p7 = scmp.ne.s32.totalorder %s4244_s23, %s3930_s15  ;;  %s4246_s14 = int_to_ptr.vmem [resolvable:$true] %s281_s14 }
  0x63   : > { %p3932_p9 = pneg %p4237_p11  ;;  %s3935_s29 = scalar_lea.hbm %s4462_s0, 9216 }
  0x64   : > { %p3936_p2 = scmp.lt.u32.totalorder %s4244_s23, %s4462_s0  ;;  %p3937_p1 = scmp.lt.u32.totalorder %s3935_s29, %s3930_s15 }
  0x65   : > { %p3933_p12 = pnand %p3932_p9, %p3931_p7  ;;  %p3939_p8 = scmp.lt.u32.totalorder %s3930_s15, %s4244_s23 }
  0x66   : > { %p3938_p4 = por %p3937_p1, %p3936_p2 }
  0x67   : > { %p3934_p0 = pneg %p3933_p12 }
  0x68   : > { %p3940_p13 = por %p3939_p8, %p3938_p4 }
  0x6a   : > { %p3941_p6 = pnand %p3940_p13, %p3934_p0 }
  0x6c   : > { %3944 = shalt.err (!%p3941_p6)
}
  0x6d   : > { %s3945_s19 = scalar_lea.vmem %s4246_s14, 4608  ;;  %s4043_s21 = smov [#allocation2]  }
  0x6e   : > { %p3946_p3 = scmp.ne.s32.totalorder %s4246_s14, %s3945_s19  ;;  %s3950_s11 = sshll.u32 %s4043_s21, 4  ;;  %s3951_s11 = int_to_ptr.vmem [resolvable:$false] %s3950_s11 }
  0x6f   : > { %s3952_s20 = scalar_lea.vmem %s3951_s11, 9216  ;;  %p3953_p12 = scmp.lt.s32.totalorder %s4246_s14, %s3951_s11 }
  0x70   : > { %p3948_p5 = pnand %p3946_p3, %p3932_p9  ;;  %p3954_p2 = scmp.lt.s32.totalorder %s3952_s20, %s3945_s19 }
  0x72   : > { %p3949_p7 = pneg %p3948_p5  ;;  %p3955_p1 = por %p3954_p2, %p3953_p12 }
  0x74   : > { %p3956_p4 = pnand %p3955_p1, %p3949_p7 }
  0x76   : > { %3959 = shalt.err (!%p3956_p4)
}
  0x77   : > { %s4044_s15 = smov 768   ;;  %s4045_s12 = smov 48  }
  0x78   : > { %3357 = dma.hbm_to_vmem [thread:$0]  (!%p4237_p11), %s4244_s23, 4608, %s4246_s14, %s4248_s13, %s4044_s15, %s4044_s15, %s4045_s12  }
  0x79   : > { %p4483_p9 = scmp.ne.s32.totalorder %s4476_s9, 0 }
  0x7a   : > { %s4279_s29 = sand.u32 (!%p4483_p9), 1, %s4026_s25   ;;  %p4484_p0 = scmp.ne.s32.totalorder (!%p4483_p9), %s4474_s30, 0 }
  0x7b   : > { %293 = sbr.rel (%p4483_p9) target bundleno = 1087 (0x43f), region = 48  ;;  %s296_s22 = scalar_lea.sflag (!%p4483_p9), [#allocation3], %s4279_s29 }
  0x7c   : > { %s3326_s17 = smul.u32 (!%p4483_p9), 288, %s4279_s29 }
  0x7e   : > { %s4283_s19 = scalar_lea.vmem (!%p4483_p9), [#allocation2], %s3326_s17 }
  0x82   : > { %4005 = dma.done.wait (%p4484_p0), %s296_s22, 4608  }
  0x83   : > { %4007 = vsyncadd (%p4484_p0), %s296_s22, 4294962688  ;;  %p4485_p11 = scmp.eq.s32.totalorder %s4110_s28, 0 }
  0x85   : > { %4009 = dma.done.wait (%p4485_p11), [#allocation6], 32768   ;;  %p4486_p8 = pmov %p4485_p11 }
  0x87   : > { %4011 = vsyncadd (%p4486_p8), [#allocation6], 4294934528  ;;  %p4487_p13 = pmov %p4486_p8 }
  0x88   : > { %p4488_p6 = pmov %p4486_p8 }
  0x89   : > { %4013 = dma.done.wait (%p4487_p13), [#allocation9], 4096  }
  0x8a   : > { %4015 = vsyncadd (%p4488_p6), [#allocation9], 4294963200  ;;  %v3414_v0 = vld [vmem:[#allocation5 + $0x4] ss:$16 sps:$4 sm:$0xff]   ;;  %v3416_v1 = vld [vmem:[#allocation5 + $0xc] ss:$16 sps:$4 sm:$0xff]  }
  0x8b   : > { %1572 = vmatprep.subr.bf16.mxu0 %v3414_v0  ;;  %v3418_v2 = vld [vmem:[#allocation5] ss:$16 sps:$4 sm:$0xff]   ;;  %v3419_v3 = vld [vmem:[#allocation5 + $0x8] ss:$16 sps:$4 sm:$0xff]   ;;  %1761 = vmatprep.subr.bf16.mxu1 %v3416_v1  ;;  %v3420_v4 = vld [vmem:[#allocation5 + $0x24] ss:$16 sps:$4 sm:$0xff]  }
  0x8c   : > { %1573 = vmatpush1.bf16.msra.mxu0 %v3418_v2  ;;  %1762 = vmatpush1.bf16.msra.mxu1 %v3419_v3  ;;  %v3422_v5 = vld [vmem:[#allocation5 + $0x2c] ss:$16 sps:$4 sm:$0xff]   ;;  %v3424_v6 = vld [vmem:[#allocation5 + $0x20] ss:$16 sps:$4 sm:$0xff]   ;;  %v3425_v7 = vld [vmem:[#allocation5 + $0x28] ss:$16 sps:$4 sm:$0xff]  }
  0x8d   : > { %1574 = vmatprep.subr.bf16.mxu0 %v3420_v4  ;;  %1763 = vmatprep.subr.bf16.mxu1 %v3422_v5  ;;  %v3426_v8 = vld [vmem:[#allocation5 + $0x44] ss:$16 sps:$4 sm:$0xff]   ;;  %v3428_v9 = vld [vmem:[#allocation5 + $0x4c] ss:$16 sps:$4 sm:$0xff]   ;;  %v3430_v10 = vld [vmem:[#allocation5 + $0x40] ss:$16 sps:$4 sm:$0xff]  }
  0x8e   : > { %v3431_v11 = vld [vmem:[#allocation5 + $0x48] ss:$16 sps:$4 sm:$0xff]   ;;  %v3432_v12 = vld [vmem:[#allocation5 + $0x64] ss:$16 sps:$4 sm:$0xff]   ;;  %v3434_v13 = vld [vmem:[#allocation5 + $0x6c] ss:$16 sps:$4 sm:$0xff]  }
  0x8f   : > { %v3436_v14 = vld [vmem:[#allocation5 + $0x60] ss:$16 sps:$4 sm:$0xff]   ;;  %v3437_v15 = vld [vmem:[#allocation5 + $0x68] ss:$16 sps:$4 sm:$0xff]   ;;  %v3438_v16 = vld [vmem:[#allocation5 + $0x84] ss:$16 sps:$4 sm:$0xff]  }
  0x90   : > { %1575 = vmatpush1.bf16.msra.mxu0 %v3424_v6  ;;  %1764 = vmatpush1.bf16.msra.mxu1 %v3425_v7  ;;  %v3440_v17 = vld [vmem:[#allocation5 + $0x8c] ss:$16 sps:$4 sm:$0xff]   ;;  %v3442_v18 = vld [vmem:[#allocation5 + $0x80] ss:$16 sps:$4 sm:$0xff]   ;;  %v3443_v19 = vld [vmem:[#allocation5 + $0x88] ss:$16 sps:$4 sm:$0xff]  }
  0x91   : > { %1576 = vmatprep.subr.bf16.mxu0 %v3426_v8  ;;  %1765 = vmatprep.subr.bf16.mxu1 %v3428_v9  ;;  %v3444_v20 = vld [vmem:[#allocation5 + $0xa4] ss:$16 sps:$4 sm:$0xff]   ;;  %v3446_v21 = vld [vmem:[#allocation5 + $0xac] ss:$16 sps:$4 sm:$0xff]   ;;  %v3448_v22 = vld [vmem:[#allocation5 + $0xa0] ss:$16 sps:$4 sm:$0xff]  }
  0x92   : > { %v3449_v23 = vld [vmem:[#allocation5 + $0xa8] ss:$16 sps:$4 sm:$0xff]   ;;  %v3450_v24 = vld [vmem:[#allocation5 + $0xc4] ss:$16 sps:$4 sm:$0xff]   ;;  %v3452_v25 = vld [vmem:[#allocation5 + $0xcc] ss:$16 sps:$4 sm:$0xff]  }
  0x93   : > { %v3454_v26 = vld [vmem:[#allocation5 + $0xc0] ss:$16 sps:$4 sm:$0xff]   ;;  %v3455_v27 = vld [vmem:[#allocation5 + $0xc8] ss:$16 sps:$4 sm:$0xff]   ;;  %v3456_v28 = vld [vmem:[#allocation5 + $0xe4] ss:$16 sps:$4 sm:$0xff]  }
  0x94   : > { %1577 = vmatpush1.bf16.msra.mxu0 %v3430_v10  ;;  %1766 = vmatpush1.bf16.msra.mxu1 %v3431_v11  ;;  %v3458_v29 = vld [vmem:[#allocation5 + $0xec] ss:$16 sps:$4 sm:$0xff]   ;;  %v3460_v30 = vld [vmem:[#allocation5 + $0xe0] ss:$16 sps:$4 sm:$0xff]   ;;  %v3461_v31 = vld [vmem:[#allocation5 + $0xe8] ss:$16 sps:$4 sm:$0xff]  }
  0x95   : > { %1578 = vmatprep.subr.bf16.mxu0 %v3432_v12  ;;  %1767 = vmatprep.subr.bf16.mxu1 %v3434_v13  ;;  %v3462_v32 = vld [vmem:[#allocation5 + $0x104] ss:$16 sps:$4 sm:$0xff]   ;;  %v3464_v33 = vld [vmem:[#allocation5 + $0x10c] ss:$16 sps:$4 sm:$0xff]   ;;  %v3466_v34 = vld [vmem:[#allocation5 + $0x100] ss:$16 sps:$4 sm:$0xff]  }
  0x96   : > { %v3467_v35 = vld [vmem:[#allocation5 + $0x108] ss:$16 sps:$4 sm:$0xff]   ;;  %v3468_v36 = vld [vmem:[#allocation5 + $0x124] ss:$16 sps:$4 sm:$0xff]   ;;  %v3470_v37 = vld [vmem:[#allocation5 + $0x12c] ss:$16 sps:$4 sm:$0xff]  }
  0x97   : > { %v3472_v38 = vld [vmem:[#allocation5 + $0x120] ss:$16 sps:$4 sm:$0xff]   ;;  %v3473_v39 = vld [vmem:[#allocation5 + $0x128] ss:$16 sps:$4 sm:$0xff]   ;;  %v3474_v40 = vld [vmem:[#allocation5 + $0x144] ss:$16 sps:$4 sm:$0xff]  }
  0x98   : > { %1579 = vmatpush1.bf16.msra.mxu0 %v3436_v14  ;;  %1768 = vmatpush1.bf16.msra.mxu1 %v3437_v15  ;;  %v3476_v41 = vld [vmem:[#allocation5 + $0x14c] ss:$16 sps:$4 sm:$0xff]   ;;  %v3478_v42 = vld [vmem:[#allocation5 + $0x140] ss:$16 sps:$4 sm:$0xff]   ;;  %v3479_v43 = vld [vmem:[#allocation5 + $0x148] ss:$16 sps:$4 sm:$0xff]  }
  0x99   : > { %1580 = vmatprep.subr.bf16.mxu0 %v3438_v16  ;;  %1769 = vmatprep.subr.bf16.mxu1 %v3440_v17  ;;  %v3480_v44 = vld [vmem:[#allocation5 + $0x164] ss:$16 sps:$4 sm:$0xff]   ;;  %v3482_v45 = vld [vmem:[#allocation5 + $0x16c] ss:$16 sps:$4 sm:$0xff]   ;;  %v3484_v48 = vld [vmem:[#allocation5 + $0x160] ss:$16 sps:$4 sm:$0xff]  }
  0x9a   : > { %v345_v46 = vld [vmem:[%s4283_s19 + $0x8] sm:$0xff]  ;;  %v351_v47 = vld [vmem:[%s4283_s19 + $0x38] sm:$0xff]  ;;  %v3486_v51 = vld [vmem:[#allocation5 + $0x184] ss:$16 sps:$4 sm:$0xff]   ;;  %s3327_s21 = smul.u32 96, %s4279_s29  ;;  %s4046_s30 = smov [#allocation10]  }
  0x9b   : > { %v3485_v49 = vld [vmem:[#allocation5 + $0x168] ss:$16 sps:$4 sm:$0xff]   ;;  %v381_v50 = vpack.c.bf16 %v351_v47, %v345_v46  ;;  %v3488_v52 = vld [vmem:[#allocation5 + $0x18c] ss:$16 sps:$4 sm:$0xff]   ;;  %v3490_v53 = vld [vmem:[#allocation5 + $0x180] ss:$16 sps:$4 sm:$0xff]  }
  0x9c   : > { %1581 = vmatpush1.bf16.msra.mxu0 %v3442_v18  ;;  %1770 = vmatpush1.bf16.msra.mxu1 %v3443_v19  ;;  %v3491_v54 = vld [vmem:[#allocation5 + $0x188] ss:$16 sps:$4 sm:$0xff]   ;;  %v3492_v55 = vld [vmem:[#allocation5 + $0x1a4] ss:$16 sps:$4 sm:$0xff]   ;;  %v3494_v56 = vld [vmem:[#allocation5 + $0x1ac] ss:$16 sps:$4 sm:$0xff]  }
  0x9d   : > { %1582 = vmatprep.subr.bf16.mxu0 %v3444_v20  ;;  %1771 = vmatprep.subr.bf16.mxu1 %v3446_v21  ;;  %v3496_v57 = vld [vmem:[#allocation5 + $0x1a0] ss:$16 sps:$4 sm:$0xff]   ;;  %v3497_v58 = vld [vmem:[#allocation5 + $0x1a8] ss:$16 sps:$4 sm:$0xff]   ;;  %v3498_v59 = vld [vmem:[#allocation5 + $0x1c4] ss:$16 sps:$4 sm:$0xff]  }
  0x9e   : > { %1604 = vmatprep.mubr.bf16.mxu0 %v381_v50  ;;  %1793 = vmatprep.mubr.bf16.mxu1 %v381_v50  ;;  %v3500_v60 = vld [vmem:[#allocation5 + $0x1cc] ss:$16 sps:$4 sm:$0xff]   ;;  %v3502_v61 = vld [vmem:[#allocation5 + $0x1c0] ss:$16 sps:$4 sm:$0xff]   ;;  %v3503_v62 = vld [vmem:[#allocation5 + $0x1c8] ss:$16 sps:$4 sm:$0xff]  }
  0x9f   : > { %v3504_v63 = vld [vmem:[#allocation5 + $0x1e4] ss:$16 sps:$4 sm:$0xff]   ;;  %v3506_v0 = vld [vmem:[#allocation5 + $0x1ec] ss:$16 sps:$4 sm:$0xff]   ;;  %v3508_v1 = vld [vmem:[#allocation5 + $0x1e0] ss:$16 sps:$4 sm:$0xff]  }
  0xa0   : > { %1583 = vmatpush1.bf16.msra.mxu0 %v3448_v22  ;;  %1772 = vmatpush1.bf16.msra.mxu1 %v3449_v23  ;;  %v3509_v2 = vld [vmem:[#allocation5 + $0x1e8] ss:$16 sps:$4 sm:$0xff]   ;;  %v3512_v3 = vld [vmem:[#allocation5 + $0x204] ss:$16 sps:$4 sm:$0xff]   ;;  %v3515_v6 = vld [vmem:[#allocation5 + $0x20c] ss:$16 sps:$4 sm:$0xff]  }
  0xa1   : > { %1584 = vmatprep.subr.bf16.mxu0 %v3450_v24  ;;  %1773 = vmatprep.subr.bf16.mxu1 %v3452_v25  ;;  %v344_v4 = vld [vmem:[%s4283_s19] sm:$0xff]  ;;  %v350_v5 = vld [vmem:[%s4283_s19 + $0x30] sm:$0xff]  ;;  %v3513_v8 = vld [vmem:[#allocation5 + $0x208] ss:$16 sps:$4 sm:$0xff]   ;;  %s4397_s11 = scalar_lea.vmem [#allocation10], %s3327_s21  ;;  %s3227_s20 = smul.u32 1536, %s4110_s28 }
  0xa2   : > { %v3510_v7 = vld [vmem:[#allocation5 + $0x200] ss:$16 sps:$4 sm:$0xff]   ;;  %v380_v9 = vpack.c.bf16 %v350_v5, %v344_v4  ;;  %v3518_v10 = vld [vmem:[#allocation5 + $0x224] ss:$16 sps:$4 sm:$0xff]   ;;  %v3521_v11 = vld [vmem:[#allocation5 + $0x22c] ss:$16 sps:$4 sm:$0xff]  }
  0xa3   : > { %v3516_v12 = vld [vmem:[#allocation5 + $0x220] ss:$16 sps:$4 sm:$0xff]   ;;  %v3519_v13 = vld [vmem:[#allocation5 + $0x228] ss:$16 sps:$4 sm:$0xff]   ;;  %v3524_v14 = vld [vmem:[#allocation5 + $0x244] ss:$16 sps:$4 sm:$0xff]   ;;  %s4413_s22 = scalar_lea.hbm %s4469_s7, %s3227_s20 }
  0xa4   : > { %1585 = vmatpush1.bf16.msra.mxu0 %v3454_v26  ;;  %1774 = vmatpush1.bf16.msra.mxu1 %v3455_v27  ;;  %v3527_v15 = vld [vmem:[#allocation5 + $0x24c] ss:$16 sps:$4 sm:$0xff]   ;;  %v3522_v16 = vld [vmem:[#allocation5 + $0x240] ss:$16 sps:$4 sm:$0xff]   ;;  %v3525_v17 = vld [vmem:[#allocation5 + $0x248] ss:$16 sps:$4 sm:$0xff]  }
  0xa5   : > { %1586 = vmatprep.subr.bf16.mxu0 %v3456_v28  ;;  %1775 = vmatprep.subr.bf16.mxu1 %v3458_v29  ;;  %v3530_v18 = vld [vmem:[#allocation5 + $0x264] ss:$16 sps:$4 sm:$0xff]   ;;  %v3533_v19 = vld [vmem:[#allocation5 + $0x26c] ss:$16 sps:$4 sm:$0xff]   ;;  %v3528_v20 = vld [vmem:[#allocation5 + $0x260] ss:$16 sps:$4 sm:$0xff]  }
  0xa6   : > { %v3531_v21 = vld [vmem:[#allocation5 + $0x268] ss:$16 sps:$4 sm:$0xff]   ;;  %v3536_v24 = vld [vmem:[#allocation5 + $0x284] ss:$16 sps:$4 sm:$0xff]   ;;  %v3539_v25 = vld [vmem:[#allocation5 + $0x28c] ss:$16 sps:$4 sm:$0xff]  }
  0xa7   : > { %v357_v22 = vld [vmem:[%s4283_s19 + $0x68] sm:$0xff]  ;;  %v363_v23 = vld [vmem:[%s4283_s19 + $0x98] sm:$0xff]  ;;  %v3534_v27 = vld [vmem:[#allocation5 + $0x280] ss:$16 sps:$4 sm:$0xff]   ;;  %s2820_s15 = sshll.u32 %s4397_s11, 4  ;;  %s2806_s28 = scalar_lea.sflag [#allocation4], %s4279_s29  ;;  %s4415_s15 = int_to_ptr.vmem [resolvable:$true] %s2820_s15 }
  0xa8   : > { %1587 = vmatpush1.bf16.msra.mxu0 %v3460_v30  ;;  %1776 = vmatpush1.bf16.msra.mxu1 %v3461_v31  ;;  %v387_v26 = vpack.c.bf16 %v363_v23, %v357_v22  ;;  %v3537_v28 = vld [vmem:[#allocation5 + $0x288] ss:$16 sps:$4 sm:$0xff]   ;;  %v356_v29 = vld [vmem:[%s4283_s19 + $0x60] sm:$0xff]  ;;  %v362_v30 = vld [vmem:[%s4283_s19 + $0x90] sm:$0xff]  ;;  %s3964_s9 = sshll.u32 %s4046_s30, 4  ;;  %s3965_s9 = int_to_ptr.vmem [resolvable:$false] %s3964_s9 }
  0xa9   : > { %1588 = vmatprep.subr.bf16.mxu0 %v3462_v32  ;;  %1777 = vmatprep.subr.bf16.mxu1 %v3464_v33  ;;  %v3542_v31 = vld [vmem:[#allocation5 + $0x2a4] ss:$16 sps:$4 sm:$0xff]   ;;  %v386_v32 = vpack.c.bf16 %v362_v30, %v356_v29  ;;  %v3545_v33 = vld [vmem:[#allocation5 + $0x2ac] ss:$16 sps:$4 sm:$0xff]   ;;  %v3579_v4 = vld [vmem:[#allocation5 + $0x368] ss:$16 sps:$4 sm:$0xff]   ;;  %p3967_p12 = scmp.lt.s32.totalorder %s4415_s15, %s3965_s9 }
  0xaa   : > { %v3554_v46 = vld [vmem:[#allocation5 + $0x2e4] ss:$16 sps:$4 sm:$0xff]   ;;  %v3557_v47 = vld [vmem:[#allocation5 + $0x2ec] ss:$16 sps:$4 sm:$0xff]   ;;  %v3609_v29 = vld [vmem:[#allocation5 + $0x408] ss:$16 sps:$4 sm:$0xff]  }
  0xab   : > { %v3584_v5 = vld [vmem:[#allocation5 + $0x384] ss:$16 sps:$4 sm:$0xff]   ;;  %s3966_s10 = scalar_lea.vmem %s3965_s9, 3072 }
  0xac   : > { %1589 = vmatpush1.bf16.msra.mxu0 %v3466_v34  ;;  %1778 = vmatpush1.bf16.msra.mxu1 %v3467_v35  ;;  %v369_v34 = vld [vmem:[%s4283_s19 + $0xc8] sm:$0xff]  ;;  %v375_v35 = vld [vmem:[%s4283_s19 + $0xf8] sm:$0xff]  ;;  %v346_v22 = vld [vmem:[%s4283_s19 + $0x10] sm:$0xff] }
  0xad   : > { %1590 = vmatprep.subr.bf16.mxu0 %v3468_v36  ;;  %1779 = vmatprep.subr.bf16.mxu1 %v3470_v37  ;;  %v3540_v36 = vld [vmem:[#allocation5 + $0x2a0] ss:$16 sps:$4 sm:$0xff]   ;;  %v3543_v37 = vld [vmem:[#allocation5 + $0x2a8] ss:$16 sps:$4 sm:$0xff]   ;;  %v3614_v30 = vld [vmem:[#allocation5 + $0x424] ss:$16 sps:$4 sm:$0xff]  }
  0xae   : > { %v352_v23 = vld [vmem:[%s4283_s19 + $0x40] sm:$0xff] }
  0xb0   : > { %1591 = vmatpush1.bf16.msra.mxu0 %v3472_v38  ;;  %1780 = vmatpush1.bf16.msra.mxu1 %v3473_v39  ;;  %v393_v38 = vpack.c.bf16 %v375_v35, %v369_v34  ;;  %v3548_v39 = vld [vmem:[#allocation5 + $0x2c4] ss:$16 sps:$4 sm:$0xff]  }
  0xb1   : > { %1592 = vmatprep.subr.bf16.mxu0 %v3474_v40  ;;  %1781 = vmatprep.subr.bf16.mxu1 %v3476_v41  ;;  %v3551_v40 = vld [vmem:[#allocation5 + $0x2cc] ss:$16 sps:$4 sm:$0xff]   ;;  %v368_v41 = vld [vmem:[%s4283_s19 + $0xc0] sm:$0xff] }
  0xb2   : > { %v3620_v35 = vld [vmem:[#allocation5 + $0x444] ss:$16 sps:$4 sm:$0xff]  }
  0xb4   : > { %1593 = vmatpush1.bf16.msra.mxu0 %v3478_v42  ;;  %1782 = vmatpush1.bf16.msra.mxu1 %v3479_v43  ;;  %v374_v42 = vld [vmem:[%s4283_s19 + $0xf0] sm:$0xff] }
  0xb5   : > { %1594 = vmatprep.subr.bf16.mxu0 %v3480_v44  ;;  %1783 = vmatprep.subr.bf16.mxu1 %v3482_v45  ;;  %v3546_v43 = vld [vmem:[#allocation5 + $0x2c0] ss:$16 sps:$4 sm:$0xff]   ;;  %v3549_v44 = vld [vmem:[#allocation5 + $0x2c8] ss:$16 sps:$4 sm:$0xff]   ;;  %v392_v45 = vpack.c.bf16 %v374_v42, %v368_v41 }
  0xb6   : > { %v377_v41 = vld [vmem:[%s4283_s19 + $0x108] sm:$0xff]  ;;  %v3618_v42 = vld [vmem:[#allocation5 + $0x440] ss:$16 sps:$4 sm:$0xff]  }
  0xb8   : > { %1595 = vmatpush1.bf16.msra.mxu0 %v3484_v48  ;;  %1784 = vmatpush1.bf16.msra.mxu1 %v3485_v49  ;;  %v347_v48 = vld [vmem:[%s4283_s19 + $0x18] sm:$0xff]  ;;  %v353_v49 = vld [vmem:[%s4283_s19 + $0x48] sm:$0xff] }
  0xb9   : > { %1596 = vmatprep.subr.bf16.mxu0 %v3486_v51  ;;  %1785 = vmatprep.subr.bf16.mxu1 %v3488_v52  ;;  %v383_v50 = vpack.c.bf16 %v353_v49, %v347_v48  ;;  %v3552_v51 = vld [vmem:[#allocation5 + $0x2e0] ss:$16 sps:$4 sm:$0xff]   ;;  %v3555_v52 = vld [vmem:[#allocation5 + $0x2e8] ss:$16 sps:$4 sm:$0xff]   ;;  %v3632_v49 = vld [vmem:[#allocation5 + $0x484] ss:$16 sps:$4 sm:$0xff]  }
  0xba   : > { %v3627_v48 = vld [vmem:[#allocation5 + $0x468] ss:$16 sps:$4 sm:$0xff]  }
  0xbc   : > { %1597 = vmatpush1.bf16.msra.mxu0 %v3490_v53  ;;  %1786 = vmatpush1.bf16.msra.mxu1 %v3491_v54  ;;  %v3560_v53 = vld [vmem:[#allocation5 + $0x304] ss:$16 sps:$4 sm:$0xff]   ;;  %v3563_v54 = vld [vmem:[#allocation5 + $0x30c] ss:$16 sps:$4 sm:$0xff]  }
  0xbd   : > { %1598 = vmatprep.subr.bf16.mxu0 %v3492_v55  ;;  %1787 = vmatprep.subr.bf16.mxu1 %v3494_v56  ;;  %v3558_v55 = vld [vmem:[#allocation5 + $0x300] ss:$16 sps:$4 sm:$0xff]   ;;  %v3561_v56 = vld [vmem:[#allocation5 + $0x308] ss:$16 sps:$4 sm:$0xff]  }
  0xc0   : > { %1599 = vmatpush1.bf16.msra.mxu0 %v3496_v57  ;;  %1788 = vmatpush1.bf16.msra.mxu1 %v3497_v58  ;;  %v3566_v57 = vld [vmem:[#allocation5 + $0x324] ss:$16 sps:$4 sm:$0xff]   ;;  %v3569_v58 = vld [vmem:[#allocation5 + $0x32c] ss:$16 sps:$4 sm:$0xff]  }
  0xc1   : > { %1600 = vmatprep.subr.bf16.mxu0 %v3498_v59  ;;  %1789 = vmatprep.subr.bf16.mxu1 %v3500_v60  ;;  %v3564_v59 = vld [vmem:[#allocation5 + $0x320] ss:$16 sps:$4 sm:$0xff]   ;;  %v3567_v60 = vld [vmem:[#allocation5 + $0x328] ss:$16 sps:$4 sm:$0xff]  }
  0xc4   : > { %1601 = vmatpush1.bf16.msra.mxu0 %v3502_v61  ;;  %1790 = vmatpush1.bf16.msra.mxu1 %v3503_v62  ;;  %v3572_v61 = vld [vmem:[#allocation5 + $0x344] ss:$16 sps:$4 sm:$0xff]   ;;  %v3575_v62 = vld [vmem:[#allocation5 + $0x34c] ss:$16 sps:$4 sm:$0xff]  }
  0xc5   : > { %1602 = vmatprep.subr.bf16.mxu0 %v3504_v63  ;;  %1791 = vmatprep.subr.bf16.mxu1 %v3506_v0  ;;  %v3570_v63 = vld [vmem:[#allocation5 + $0x340] ss:$16 sps:$4 sm:$0xff]   ;;  %v3573_v0 = vld [vmem:[#allocation5 + $0x348] ss:$16 sps:$4 sm:$0xff]  }
  0xc8   : > { %1603 = vmatpush1.bf16.msra.mxu0 %v3508_v1  ;;  %1792 = vmatpush1.bf16.msra.mxu1 %v3509_v2  ;;  %v3578_v1 = vld [vmem:[#allocation5 + $0x364] ss:$16 sps:$4 sm:$0xff]   ;;  %v3581_v2 = vld [vmem:[#allocation5 + $0x36c] ss:$16 sps:$4 sm:$0xff]  }
  0xc9   : > { %1635 = vmatprep.subr.bf16.mxu0 %v3512_v3  ;;  %1824 = vmatprep.subr.bf16.mxu1 %v3515_v6  ;;  %v3576_v3 = vld [vmem:[#allocation5 + $0x360] ss:$16 sps:$4 sm:$0xff]   ;;  %v3587_v6 = vld [vmem:[#allocation5 + $0x38c] ss:$16 sps:$4 sm:$0xff]  }
  0xcb   : > { %1605 = vmatmul.mubr.bf16.vlgmr.msra.gmra.mrb[0].mxu0 %v380_v9  ;;  %1794 = vmatmul.mubr.bf16.vlgmr.msra.gmra.mrb[0].mxu1 %v380_v9  ;;  %v3590_v9 = vld [vmem:[#allocation5 + $0x3a4] ss:$16 sps:$4 sm:$0xff]  }
  0xcc   : > { %1636 = vmatpush1.bf16.msra.mxu0 %v3510_v7  ;;  %1825 = vmatpush1.bf16.msra.mxu1 %v3513_v8  ;;  %v3582_v7 = vld [vmem:[#allocation5 + $0x380] ss:$16 sps:$4 sm:$0xff]   ;;  %v3585_v8 = vld [vmem:[#allocation5 + $0x388] ss:$16 sps:$4 sm:$0xff]  }
  0xcd   : > { %1637 = vmatprep.subr.bf16.mxu0 %v3518_v10  ;;  %1826 = vmatprep.subr.bf16.mxu1 %v3521_v11  ;;  %v3593_v10 = vld [vmem:[#allocation5 + $0x3ac] ss:$16 sps:$4 sm:$0xff]   ;;  %v3588_v11 = vld [vmem:[#allocation5 + $0x3a0] ss:$16 sps:$4 sm:$0xff]  }
  0xce   : > { %1614 = vmatprep.mubr.bf16.mxu0 %v387_v26  ;;  %1803 = vmatprep.mubr.bf16.mxu1 %v387_v26  ;;  %v382_v26 = vpack.c.bf16 %v352_v23, %v346_v22  ;;  %v3675_v22 = vld [vmem:[#allocation5 + $0x568] ss:$16 sps:$4 sm:$0xff]   ;;  %v3680_v23 = vld [vmem:[#allocation5 + $0x584] ss:$16 sps:$4 sm:$0xff]  }
  0xd0   : > { %1638 = vmatpush1.bf16.msra.mxu0 %v3516_v12  ;;  %1827 = vmatpush1.bf16.msra.mxu1 %v3519_v13  ;;  %v3591_v12 = vld [vmem:[#allocation5 + $0x3a8] ss:$16 sps:$4 sm:$0xff]   ;;  %v3596_v13 = vld [vmem:[#allocation5 + $0x3c4] ss:$16 sps:$4 sm:$0xff]  }
  0xd1   : > { %1639 = vmatprep.subr.bf16.mxu0 %v3524_v14  ;;  %1828 = vmatprep.subr.bf16.mxu1 %v3527_v15  ;;  %v3599_v14 = vld [vmem:[#allocation5 + $0x3cc] ss:$16 sps:$4 sm:$0xff]   ;;  %v3594_v15 = vld [vmem:[#allocation5 + $0x3c0] ss:$16 sps:$4 sm:$0xff]  }
  0xd3   : > { %1615 = vmatmul.mubr.bf16.gmra.mrb[4].mxu0 %v386_v32  ;;  %1804 = vmatmul.mubr.bf16.gmra.mrb[4].mxu1 %v386_v32  ;;  %v3612_v32 = vld [vmem:[#allocation5 + $0x420] ss:$16 sps:$4 sm:$0xff]  }
  0xd4   : > { %1640 = vmatpush1.bf16.msra.mxu0 %v3522_v16  ;;  %1829 = vmatpush1.bf16.msra.mxu1 %v3525_v17  ;;  %v3597_v16 = vld [vmem:[#allocation5 + $0x3c8] ss:$16 sps:$4 sm:$0xff]   ;;  %v3602_v17 = vld [vmem:[#allocation5 + $0x3e4] ss:$16 sps:$4 sm:$0xff]  }
  0xd5   : > { %1641 = vmatprep.subr.bf16.mxu0 %v3530_v18  ;;  %1830 = vmatprep.subr.bf16.mxu1 %v3533_v19  ;;  %v3605_v18 = vld [vmem:[#allocation5 + $0x3ec] ss:$16 sps:$4 sm:$0xff]   ;;  %v3600_v19 = vld [vmem:[#allocation5 + $0x3e0] ss:$16 sps:$4 sm:$0xff]  }
  0xd6   : > { %1624 = vmatprep.mubr.bf16.mxu0 %v393_v38  ;;  %1813 = vmatprep.mubr.bf16.mxu1 %v393_v38  ;;  %v3623_v38 = vld [vmem:[#allocation5 + $0x44c] ss:$16 sps:$4 sm:$0xff]  }
  0xd8   : > { %1642 = vmatpush1.bf16.msra.mxu0 %v3528_v20  ;;  %1831 = vmatpush1.bf16.msra.mxu1 %v3531_v21  ;;  %v3603_v20 = vld [vmem:[#allocation5 + $0x3e8] ss:$16 sps:$4 sm:$0xff]   ;;  %v3608_v21 = vld [vmem:[#allocation5 + $0x404] ss:$16 sps:$4 sm:$0xff]  }
  0xd9   : > { %1643 = vmatprep.subr.bf16.mxu0 %v3536_v24  ;;  %1832 = vmatprep.subr.bf16.mxu1 %v3539_v25  ;;  %v3611_v24 = vld [vmem:[#allocation5 + $0x40c] ss:$16 sps:$4 sm:$0xff]   ;;  %v3606_v25 = vld [vmem:[#allocation5 + $0x400] ss:$16 sps:$4 sm:$0xff]  }
  0xdb   : > { %1625 = vmatmul.mubr.bf16.gmra.mrb[8].mxu0 %v392_v45  ;;  %1814 = vmatmul.mubr.bf16.gmra.mrb[8].mxu1 %v392_v45  ;;  %v3629_v45 = vld [vmem:[#allocation5 + $0x46c] ss:$16 sps:$4 sm:$0xff]  }
  0xdc   : > { %1644 = vmatpush1.bf16.msra.mxu0 %v3534_v27  ;;  %1833 = vmatpush1.bf16.msra.mxu1 %v3537_v28  ;;  %v359_v27 = vld [vmem:[%s4283_s19 + $0x78] sm:$0xff]  ;;  %v365_v28 = vld [vmem:[%s4283_s19 + $0xa8] sm:$0xff] }
  0xdd   : > { %1645 = vmatprep.subr.bf16.mxu0 %v3542_v31  ;;  %1834 = vmatprep.subr.bf16.mxu1 %v3545_v33  ;;  %v3617_v31 = vld [vmem:[#allocation5 + $0x42c] ss:$16 sps:$4 sm:$0xff]   ;;  %v3615_v33 = vld [vmem:[#allocation5 + $0x428] ss:$16 sps:$4 sm:$0xff]   ;;  %v389_v34 = vpack.c.bf16 %v365_v28, %v359_v27  ;;  %v3686_v27 = vld [vmem:[#allocation5 + $0x5a4] ss:$16 sps:$4 sm:$0xff]  }
  0xde   : > { %1667 = vmatprep.mubr.bf16.mxu0 %v383_v50  ;;  %1856 = vmatprep.mubr.bf16.mxu1 %v383_v50  ;;  %v370_v50 = vld [vmem:[%s4283_s19 + $0xd0] sm:$0xff]  ;;  %v3689_v28 = vld [vmem:[#allocation5 + $0x5ac] ss:$16 sps:$4 sm:$0xff]  }
  0xe0   : > { %1646 = vmatpush1.bf16.msra.mxu0 %v3540_v36  ;;  %1835 = vmatpush1.bf16.msra.mxu1 %v3543_v37  ;;  %v358_v36 = vld [vmem:[%s4283_s19 + $0x70] sm:$0xff]  ;;  %v364_v37 = vld [vmem:[%s4283_s19 + $0xa0] sm:$0xff] }
  0xe1   : > { %1647 = vmatprep.subr.bf16.mxu0 %v3548_v39  ;;  %1836 = vmatprep.subr.bf16.mxu1 %v3551_v40  ;;  %v388_v39 = vpack.c.bf16 %v364_v37, %v358_v36  ;;  %v371_v40 = vld [vmem:[%s4283_s19 + $0xd8] sm:$0xff]  ;;  %v3696_v37 = vld [vmem:[#allocation5 + $0x5e0] ss:$16 sps:$4 sm:$0xff]  }
  0xe2   : > { %v3701_v36 = vld [vmem:[#allocation5 + $0x5ec] ss:$16 sps:$4 sm:$0xff]  }
  0xe4   : > { %1648 = vmatpush1.bf16.msra.mxu0 %v3546_v43  ;;  %1837 = vmatpush1.bf16.msra.mxu1 %v3549_v44  ;;  %v3621_v43 = vld [vmem:[#allocation5 + $0x448] ss:$16 sps:$4 sm:$0xff]   ;;  %v3626_v44 = vld [vmem:[#allocation5 + $0x464] ss:$16 sps:$4 sm:$0xff]  }
  0xe5   : > { %1649 = vmatprep.subr.bf16.mxu0 %v3554_v46  ;;  %1838 = vmatprep.subr.bf16.mxu1 %v3557_v47  ;;  %v3624_v46 = vld [vmem:[#allocation5 + $0x460] ss:$16 sps:$4 sm:$0xff]   ;;  %v395_v47 = vpack.c.bf16 %v377_v41, %v371_v40  ;;  %v361_v41 = vld [vmem:[%s4283_s19 + $0x88] sm:$0xff] }
  0xe6   : > { %v354_v40 = vld [vmem:[%s4283_s19 + $0x50] sm:$0xff] }
  0xe8   : > { %1650 = vmatpush1.bf16.msra.mxu0 %v3552_v51  ;;  %1839 = vmatpush1.bf16.msra.mxu1 %v3555_v52  ;;  %v376_v51 = vld [vmem:[%s4283_s19 + $0x100] sm:$0xff]  ;;  %v3635_v52 = vld [vmem:[#allocation5 + $0x48c] ss:$16 sps:$4 sm:$0xff]  }
  0xe9   : > { %1651 = vmatprep.subr.bf16.mxu0 %v3560_v53  ;;  %1840 = vmatprep.subr.bf16.mxu1 %v3563_v54  ;;  %v3630_v53 = vld [vmem:[#allocation5 + $0x480] ss:$16 sps:$4 sm:$0xff]   ;;  %v3633_v54 = vld [vmem:[#allocation5 + $0x488] ss:$16 sps:$4 sm:$0xff]  }
  0xec   : > { %1652 = vmatpush1.bf16.msra.mxu0 %v3558_v55  ;;  %1841 = vmatpush1.bf16.msra.mxu1 %v3561_v56  ;;  %v394_v55 = vpack.c.bf16 %v376_v51, %v370_v50  ;;  %v349_v56 = vld [vmem:[%s4283_s19 + $0x28] sm:$0xff]  ;;  %v379_v51 = vld [vmem:[%s4283_s19 + $0x118] sm:$0xff] }
  0xed   : > { %1653 = vmatprep.subr.bf16.mxu0 %v3566_v57  ;;  %1842 = vmatprep.subr.bf16.mxu1 %v3569_v58  ;;  %v355_v57 = vld [vmem:[%s4283_s19 + $0x58] sm:$0xff]  ;;  %v3638_v58 = vld [vmem:[#allocation5 + $0x4a4] ss:$16 sps:$4 sm:$0xff]   ;;  %v373_v50 = vld [vmem:[%s4283_s19 + $0xe8] sm:$0xff] }
  0xf0   : > { %1654 = vmatpush1.bf16.msra.mxu0 %v3564_v59  ;;  %1843 = vmatpush1.bf16.msra.mxu1 %v3567_v60  ;;  %v3641_v59 = vld [vmem:[#allocation5 + $0x4ac] ss:$16 sps:$4 sm:$0xff]   ;;  %v385_v60 = vpack.c.bf16 %v355_v57, %v349_v56  ;;  %v3708_v56 = vld [vmem:[#allocation7 + $0x20] ss:$8 sps:$4 sm:$0xff]  }
  0xf1   : > { %1655 = vmatprep.subr.bf16.mxu0 %v3572_v61  ;;  %1844 = vmatprep.subr.bf16.mxu1 %v3575_v62  ;;  %v3636_v61 = vld [vmem:[#allocation5 + $0x4a0] ss:$16 sps:$4 sm:$0xff]   ;;  %v3639_v62 = vld [vmem:[#allocation5 + $0x4a8] ss:$16 sps:$4 sm:$0xff]   ;;  %v3713_v57 = vld [vmem:[#allocation7 + $0x34] ss:$8 sps:$4 sm:$0xff]  }
  0xf4   : > { %1656 = vmatpush1.bf16.msra.mxu0 %v3570_v63  ;;  %1845 = vmatpush1.bf16.msra.mxu1 %v3573_v0  ;;  %v3644_v63 = vld [vmem:[#allocation5 + $0x4c4] ss:$16 sps:$4 sm:$0xff]   ;;  %v3647_v0 = vld [vmem:[#allocation5 + $0x4cc] ss:$16 sps:$4 sm:$0xff]  }
  0xf5   : > { %1657 = vmatprep.subr.bf16.mxu0 %v3578_v1  ;;  %1846 = vmatprep.subr.bf16.mxu1 %v3581_v2  ;;  %v3642_v1 = vld [vmem:[#allocation5 + $0x4c0] ss:$16 sps:$4 sm:$0xff]   ;;  %v3645_v2 = vld [vmem:[#allocation5 + $0x4c8] ss:$16 sps:$4 sm:$0xff]  }
  0xf8   : > { %1658 = vmatpush1.bf16.msra.mxu0 %v3576_v3  ;;  %1847 = vmatpush1.bf16.msra.mxu1 %v3579_v4  ;;  %v3650_v3 = vld [vmem:[#allocation5 + $0x4e4] ss:$16 sps:$4 sm:$0xff]   ;;  %v3653_v4 = vld [vmem:[#allocation5 + $0x4ec] ss:$16 sps:$4 sm:$0xff]  }
  0xf9   : > { %1659 = vmatprep.subr.bf16.mxu0 %v3584_v5  ;;  %1848 = vmatprep.subr.bf16.mxu1 %v3587_v6  ;;  %v3648_v5 = vld [vmem:[#allocation5 + $0x4e0] ss:$16 sps:$4 sm:$0xff]   ;;  %v3651_v6 = vld [vmem:[#allocation5 + $0x4e8] ss:$16 sps:$4 sm:$0xff]  }
  0xfc   : > { %1660 = vmatpush1.bf16.msra.mxu0 %v3582_v7  ;;  %1849 = vmatpush1.bf16.msra.mxu1 %v3585_v8  ;;  %v3656_v7 = vld [vmem:[#allocation5 + $0x504] ss:$16 sps:$4 sm:$0xff]   ;;  %v3659_v8 = vld [vmem:[#allocation5 + $0x50c] ss:$16 sps:$4 sm:$0xff]  }
  0xfd   : > { %1661 = vmatprep.subr.bf16.mxu0 %v3590_v9  ;;  %1850 = vmatprep.subr.bf16.mxu1 %v3593_v10  ;;  %v3654_v9 = vld [vmem:[#allocation5 + $0x500] ss:$16 sps:$4 sm:$0xff]   ;;  %v3657_v10 = vld [vmem:[#allocation5 + $0x508] ss:$16 sps:$4 sm:$0xff]  }
 0x100   : > { %1662 = vmatpush1.bf16.msra.mxu0 %v3588_v11  ;;  %1851 = vmatpush1.bf16.msra.mxu1 %v3591_v12  ;;  %v3662_v11 = vld [vmem:[#allocation5 + $0x524] ss:$16 sps:$4 sm:$0xff]   ;;  %v3665_v12 = vld [vmem:[#allocation5 + $0x52c] ss:$16 sps:$4 sm:$0xff]  }
 0x101   : > { %1663 = vmatprep.subr.bf16.mxu0 %v3596_v13  ;;  %1852 = vmatprep.subr.bf16.mxu1 %v3599_v14  ;;  %v3660_v13 = vld [vmem:[#allocation5 + $0x520] ss:$16 sps:$4 sm:$0xff]   ;;  %v3663_v14 = vld [vmem:[#allocation5 + $0x528] ss:$16 sps:$4 sm:$0xff]  }
 0x104   : > { %1664 = vmatpush1.bf16.msra.mxu0 %v3594_v15  ;;  %1853 = vmatpush1.bf16.msra.mxu1 %v3597_v16  ;;  %v3668_v15 = vld [vmem:[#allocation5 + $0x544] ss:$16 sps:$4 sm:$0xff]   ;;  %v3671_v16 = vld [vmem:[#allocation5 + $0x54c] ss:$16 sps:$4 sm:$0xff]  }
 0x105   : > { %1665 = vmatprep.subr.bf16.mxu0 %v3602_v17  ;;  %1854 = vmatprep.subr.bf16.mxu1 %v3605_v18  ;;  %v3666_v17 = vld [vmem:[#allocation5 + $0x540] ss:$16 sps:$4 sm:$0xff]   ;;  %v3669_v18 = vld [vmem:[#allocation5 + $0x548] ss:$16 sps:$4 sm:$0xff]  }
 0x108   : > { %1666 = vmatpush1.bf16.msra.mxu0 %v3600_v19  ;;  %1855 = vmatpush1.bf16.msra.mxu1 %v3603_v20  ;;  %v3674_v19 = vld [vmem:[#allocation5 + $0x564] ss:$16 sps:$4 sm:$0xff]   ;;  %v3677_v20 = vld [vmem:[#allocation5 + $0x56c] ss:$16 sps:$4 sm:$0xff]  }
 0x109   : > { %1698 = vmatprep.subr.bf16.mxu0 %v3608_v21  ;;  %1887 = vmatprep.subr.bf16.mxu1 %v3611_v24  ;;  %v3672_v21 = vld [vmem:[#allocation5 + $0x560] ss:$16 sps:$4 sm:$0xff]   ;;  %v3683_v24 = vld [vmem:[#allocation5 + $0x58c] ss:$16 sps:$4 sm:$0xff]  }
 0x10b   : > { %1668 = vmatmul.mubr.bf16.vlgmr.msra.gmra.mrb[0].mxu0 %v382_v26  ;;  %1857 = vmatmul.mubr.bf16.vlgmr.msra.gmra.mrb[0].mxu1 %v382_v26  ;;  %v3681_v26 = vld [vmem:[#allocation5 + $0x588] ss:$16 sps:$4 sm:$0xff]  }
 0x10c   : > { %1699 = vmatpush1.bf16.msra.mxu0 %v3606_v25  ;;  %1888 = vmatpush1.bf16.msra.mxu1 %v3609_v29  ;;  %v3678_v25 = vld [vmem:[#allocation5 + $0x580] ss:$16 sps:$4 sm:$0xff]  }
 0x10d   : > { %1700 = vmatprep.subr.bf16.mxu0 %v3614_v30  ;;  %1889 = vmatprep.subr.bf16.mxu1 %v3617_v31  ;;  %v3684_v29 = vld [vmem:[#allocation5 + $0x5a0] ss:$16 sps:$4 sm:$0xff]   ;;  %v3687_v30 = vld [vmem:[#allocation5 + $0x5a8] ss:$16 sps:$4 sm:$0xff]   ;;  %v3692_v31 = vld [vmem:[#allocation5 + $0x5c4] ss:$16 sps:$4 sm:$0xff]  }
 0x10e   : > { %1677 = vmatprep.mubr.bf16.mxu0 %v389_v34  ;;  %1866 = vmatprep.mubr.bf16.mxu1 %v389_v34  ;;  %v3693_v34 = vld [vmem:[#allocation5 + $0x5c8] ss:$16 sps:$4 sm:$0xff]  }
 0x110   : > { %1701 = vmatpush1.bf16.msra.mxu0 %v3612_v32  ;;  %1890 = vmatpush1.bf16.msra.mxu1 %v3615_v33  ;;  %v3695_v32 = vld [vmem:[#allocation5 + $0x5cc] ss:$16 sps:$4 sm:$0xff]   ;;  %v3690_v33 = vld [vmem:[#allocation5 + $0x5c0] ss:$16 sps:$4 sm:$0xff]  }
 0x111   : > { %1702 = vmatprep.subr.bf16.mxu0 %v3620_v35  ;;  %1891 = vmatprep.subr.bf16.mxu1 %v3623_v38  ;;  %v3698_v35 = vld [vmem:[#allocation5 + $0x5e4] ss:$16 sps:$4 sm:$0xff]   ;;  %v3699_v38 = vld [vmem:[#allocation5 + $0x5e8] ss:$16 sps:$4 sm:$0xff]  }
 0x113   : > { %1678 = vmatmul.mubr.bf16.gmra.mrb[4].mxu0 %v388_v39  ;;  %1867 = vmatmul.mubr.bf16.gmra.mrb[4].mxu1 %v388_v39  ;;  %v348_v39 = vld [vmem:[%s4283_s19 + $0x20] sm:$0xff] }
 0x114   : > { %1703 = vmatpush1.bf16.msra.mxu0 %v3618_v42  ;;  %1892 = vmatpush1.bf16.msra.mxu1 %v3621_v43  ;;  %v367_v42 = vld [vmem:[%s4283_s19 + $0xb8] sm:$0xff]  ;;  %v3704_v43 = vld [vmem:[#allocation7 + $0x4] ss:$8 sps:$4 sm:$0xff]  }
 0x115   : > { %1704 = vmatprep.subr.bf16.mxu0 %v3626_v44  ;;  %1893 = vmatprep.subr.bf16.mxu1 %v3629_v45  ;;  %v384_v44 = vpack.c.bf16 %v354_v40, %v348_v39  ;;  %v391_v45 = vpack.c.bf16 %v367_v42, %v361_v41  ;;  %v3819_v40 = vld [vmem:[#allocation8 + $0x70] ss:$8 sps:$4 sm:$0xff]   ;;  %v3824_v41 = vld [vmem:[#allocation8 + $0x84] ss:$8 sps:$4 sm:$0xff]  }
 0x116   : > { %1687 = vmatprep.mubr.bf16.mxu0 %v395_v47  ;;  %1876 = vmatprep.mubr.bf16.mxu1 %v395_v47  ;;  %v3707_v47 = vld [vmem:[#allocation7 + $0x14] ss:$8 sps:$4 sm:$0xff]  }
 0x118   : > { %1705 = vmatpush1.bf16.msra.mxu0 %v3624_v46  ;;  %1894 = vmatpush1.bf16.msra.mxu1 %v3627_v48  ;;  %v3702_v46 = vld [vmem:[#allocation7] ss:$8 sps:$4 sm:$0xff]  }
 0x119   : > { %1706 = vmatprep.subr.bf16.mxu0 %v3632_v49  ;;  %1895 = vmatprep.subr.bf16.mxu1 %v3635_v52  ;;  %v360_v48 = vld [vmem:[%s4283_s19 + $0x80] sm:$0xff]  ;;  %v366_v49 = vld [vmem:[%s4283_s19 + $0xb0] sm:$0xff] }
 0x11a   : > { %v3705_v52 = vld [vmem:[#allocation7 + $0x10] ss:$8 sps:$4 sm:$0xff]  }
 0x11b   : > { %1688 = vmatmul.mubr.bf16.gmra.mrb[8].mxu0 %v394_v55  ;;  %1877 = vmatmul.mubr.bf16.gmra.mrb[8].mxu1 %v394_v55  ;;  %v397_v55 = vpack.c.bf16 %v379_v51, %v373_v50 }
 0x11c   : > { %1707 = vmatpush1.bf16.msra.mxu0 %v3630_v53  ;;  %1896 = vmatpush1.bf16.msra.mxu1 %v3633_v54  ;;  %v3710_v53 = vld [vmem:[#allocation7 + $0x24] ss:$8 sps:$4 sm:$0xff]   ;;  %v390_v54 = vpack.c.bf16 %v366_v49, %v360_v48  ;;  %v3827_v48 = vld [vmem:[#allocation8 + $0x94] ss:$8 sps:$4 sm:$0xff]  }
 0x11d   : > { %1708 = vmatprep.subr.bf16.mxu0 %v3638_v58  ;;  %1897 = vmatprep.subr.bf16.mxu1 %v3641_v59  ;;  %v372_v58 = vld [vmem:[%s4283_s19 + $0xe0] sm:$0xff]  ;;  %v378_v59 = vld [vmem:[%s4283_s19 + $0x110] sm:$0xff]  ;;  %s3960_s19 = scalar_lea.vmem %s4415_s15, 1536 }
 0x11e   : > { %1730 = vmatprep.mubr.bf16.mxu0 %v385_v60  ;;  %1919 = vmatprep.mubr.bf16.mxu1 %v385_v60  ;;  %v3711_v60 = vld [vmem:[#allocation7 + $0x30] ss:$8 sps:$4 sm:$0xff]   ;;  %p3961_p3 = scmp.ne.s32.totalorder %s4415_s15, %s3960_s19  ;;  %p3968_p2 = scmp.lt.s32.totalorder %s3966_s10, %s3960_s19 }
 0x120   : > { %1709 = vmatpush1.bf16.msra.mxu0 %v3636_v61  ;;  %1898 = vmatpush1.bf16.msra.mxu1 %v3639_v62  ;;  %v3716_v61 = vld [vmem:[#allocation7 + $0x44] ss:$8 sps:$4 sm:$0xff]   ;;  %v396_v62 = vpack.c.bf16 %v378_v59, %v372_v58  ;;  %p3962_p5 = pnand %p3961_p3, %p4227_p10  ;;  %p3969_p1 = por %p3968_p2, %p3967_p12 }
 0x121   : > { %1710 = vmatprep.subr.bf16.mxu0 %v3644_v63  ;;  %1899 = vmatprep.subr.bf16.mxu1 %v3647_v0  ;;  %v3714_v63 = vld [vmem:[#allocation7 + $0x40] ss:$8 sps:$4 sm:$0xff]   ;;  %v3719_v0 = vld [vmem:[#allocation7 + $0x54] ss:$8 sps:$4 sm:$0xff]  }
 0x122   : > { %p3963_p7 = pneg %p3962_p5 }
 0x124   : > { %1711 = vmatpush1.bf16.msra.mxu0 %v3642_v1  ;;  %1900 = vmatpush1.bf16.msra.mxu1 %v3645_v2  ;;  %v3717_v1 = vld [vmem:[#allocation7 + $0x50] ss:$8 sps:$4 sm:$0xff]   ;;  %v3722_v2 = vld [vmem:[#allocation7 + $0x64] ss:$8 sps:$4 sm:$0xff]   ;;  %p3970_p4 = pnand %p3969_p1, %p3963_p7 }
 0x125   : > { %1712 = vmatprep.subr.bf16.mxu0 %v3650_v3  ;;  %1901 = vmatprep.subr.bf16.mxu1 %v3653_v4  ;;  %v3720_v3 = vld [vmem:[#allocation7 + $0x60] ss:$8 sps:$4 sm:$0xff]   ;;  %v3725_v4 = vld [vmem:[#allocation7 + $0x74] ss:$8 sps:$4 sm:$0xff]  }
 0x128   : > { %1713 = vmatpush1.bf16.msra.mxu0 %v3648_v5  ;;  %1902 = vmatpush1.bf16.msra.mxu1 %v3651_v6  ;;  %v3723_v5 = vld [vmem:[#allocation7 + $0x70] ss:$8 sps:$4 sm:$0xff]   ;;  %v3728_v6 = vld [vmem:[#allocation7 + $0x84] ss:$8 sps:$4 sm:$0xff]  }
 0x129   : > { %1714 = vmatprep.subr.bf16.mxu0 %v3656_v7  ;;  %1903 = vmatprep.subr.bf16.mxu1 %v3659_v8  ;;  %v3726_v7 = vld [vmem:[#allocation7 + $0x80] ss:$8 sps:$4 sm:$0xff]   ;;  %v3731_v8 = vld [vmem:[#allocation7 + $0x94] ss:$8 sps:$4 sm:$0xff]  }
 0x12c   : > { %1715 = vmatpush1.bf16.msra.mxu0 %v3654_v9  ;;  %1904 = vmatpush1.bf16.msra.mxu1 %v3657_v10  ;;  %v3729_v9 = vld [vmem:[#allocation7 + $0x90] ss:$8 sps:$4 sm:$0xff]   ;;  %v3734_v10 = vld [vmem:[#allocation7 + $0xa4] ss:$8 sps:$4 sm:$0xff]  }
 0x12d   : > { %1716 = vmatprep.subr.bf16.mxu0 %v3662_v11  ;;  %1905 = vmatprep.subr.bf16.mxu1 %v3665_v12  ;;  %v3732_v11 = vld [vmem:[#allocation7 + $0xa0] ss:$8 sps:$4 sm:$0xff]   ;;  %v3737_v12 = vld [vmem:[#allocation7 + $0xb4] ss:$8 sps:$4 sm:$0xff]  }
 0x130   : > { %1717 = vmatpush1.bf16.msra.mxu0 %v3660_v13  ;;  %1906 = vmatpush1.bf16.msra.mxu1 %v3663_v14  ;;  %v3735_v13 = vld [vmem:[#allocation7 + $0xb0] ss:$8 sps:$4 sm:$0xff]   ;;  %v3740_v14 = vld [vmem:[#allocation7 + $0xc4] ss:$8 sps:$4 sm:$0xff]  }
 0x131   : > { %1718 = vmatprep.subr.bf16.mxu0 %v3668_v15  ;;  %1907 = vmatprep.subr.bf16.mxu1 %v3671_v16  ;;  %v3738_v15 = vld [vmem:[#allocation7 + $0xc0] ss:$8 sps:$4 sm:$0xff]   ;;  %v3743_v16 = vld [vmem:[#allocation7 + $0xd4] ss:$8 sps:$4 sm:$0xff]  }
 0x134   : > { %1719 = vmatpush1.bf16.msra.mxu0 %v3666_v17  ;;  %1908 = vmatpush1.bf16.msra.mxu1 %v3669_v18  ;;  %v3741_v17 = vld [vmem:[#allocation7 + $0xd0] ss:$8 sps:$4 sm:$0xff]   ;;  %v3746_v18 = vld [vmem:[#allocation7 + $0xe4] ss:$8 sps:$4 sm:$0xff]  }
 0x135   : > { %1720 = vmatprep.subr.bf16.mxu0 %v3674_v19  ;;  %1909 = vmatprep.subr.bf16.mxu1 %v3677_v20  ;;  %v3744_v19 = vld [vmem:[#allocation7 + $0xe0] ss:$8 sps:$4 sm:$0xff]   ;;  %v3749_v20 = vld [vmem:[#allocation7 + $0xf4] ss:$8 sps:$4 sm:$0xff]  }
 0x138   : > { %1721 = vmatpush1.bf16.msra.mxu0 %v3672_v21  ;;  %1910 = vmatpush1.bf16.msra.mxu1 %v3675_v22  ;;  %v3747_v21 = vld [vmem:[#allocation7 + $0xf0] ss:$8 sps:$4 sm:$0xff]   ;;  %v3752_v22 = vld [vmem:[#allocation7 + $0x104] ss:$8 sps:$4 sm:$0xff]  }
 0x139   : > { %1722 = vmatprep.subr.bf16.mxu0 %v3680_v23  ;;  %1911 = vmatprep.subr.bf16.mxu1 %v3683_v24  ;;  %v3798_v23 = vld [vmem:[#allocation8] ss:$8 sps:$4 sm:$0xff]   ;;  %v3800_v24 = vld [vmem:[#allocation8 + $0x4] ss:$8 sps:$4 sm:$0xff]  }
 0x13c   : > { %1723 = vmatpush1.bf16.msra.mxu0 %v3678_v25  ;;  %1912 = vmatpush1.bf16.msra.mxu1 %v3681_v26  ;;  %v3803_v25 = vld [vmem:[#allocation8 + $0x14] ss:$8 sps:$4 sm:$0xff]   ;;  %v3801_v26 = vld [vmem:[#allocation8 + $0x10] ss:$8 sps:$4 sm:$0xff]  }
 0x13d   : > { %1724 = vmatprep.subr.bf16.mxu0 %v3686_v27  ;;  %1913 = vmatprep.subr.bf16.mxu1 %v3689_v28  ;;  %v3806_v27 = vld [vmem:[#allocation8 + $0x24] ss:$8 sps:$4 sm:$0xff]   ;;  %v3804_v28 = vld [vmem:[#allocation8 + $0x20] ss:$8 sps:$4 sm:$0xff]  }
 0x140   : > { %1725 = vmatpush1.bf16.msra.mxu0 %v3684_v29  ;;  %1914 = vmatpush1.bf16.msra.mxu1 %v3687_v30  ;;  %v3809_v29 = vld [vmem:[#allocation8 + $0x34] ss:$8 sps:$4 sm:$0xff]   ;;  %v3807_v30 = vld [vmem:[#allocation8 + $0x30] ss:$8 sps:$4 sm:$0xff]  }
 0x141   : > { %1726 = vmatprep.subr.bf16.mxu0 %v3692_v31  ;;  %1915 = vmatprep.subr.bf16.mxu1 %v3695_v32  ;;  %v3812_v31 = vld [vmem:[#allocation8 + $0x44] ss:$8 sps:$4 sm:$0xff]   ;;  %v3810_v32 = vld [vmem:[#allocation8 + $0x40] ss:$8 sps:$4 sm:$0xff]  }
 0x144   : > { %1727 = vmatpush1.bf16.msra.mxu0 %v3690_v33  ;;  %1916 = vmatpush1.bf16.msra.mxu1 %v3693_v34  ;;  %v3815_v33 = vld [vmem:[#allocation8 + $0x54] ss:$8 sps:$4 sm:$0xff]   ;;  %v3813_v34 = vld [vmem:[#allocation8 + $0x50] ss:$8 sps:$4 sm:$0xff]  }
 0x145   : > { %1728 = vmatprep.subr.bf16.mxu0 %v3698_v35  ;;  %1917 = vmatprep.subr.bf16.mxu1 %v3701_v36  ;;  %v3818_v35 = vld [vmem:[#allocation8 + $0x64] ss:$8 sps:$4 sm:$0xff]   ;;  %v592_v36 = vlaneseq }
 0x147   : > { %v593_v39 = vshrl.u32 %v592_v36, 7 }
 0x148   : > { %1729 = vmatpush1.bf16.msra.mxu0 %v3696_v37  ;;  %1918 = vmatpush1.bf16.msra.mxu1 %v3699_v38  ;;  %v3816_v37 = vld [vmem:[#allocation8 + $0x60] ss:$8 sps:$4 sm:$0xff]   ;;  %v3821_v38 = vld [vmem:[#allocation8 + $0x74] ss:$8 sps:$4 sm:$0xff]  }
 0x149   : > { %2382 = vmatprep.subr.bf16.mxu0 %v3704_v43  ;;  %2730 = vmatprep.subr.bf16.mxu1 %v3800_v24  ;;  %v4333_v42 = vsub.s32 0, %v593_v39  ;;  %v602_v43 = vsub.s32 2, %v593_v39 }
 0x14b   : > { %1731 = vmatmul.mubr.bf16.vlgmr.msra.gmra.mrb[0].mxu0 %v384_v44  ;;  %1920 = vmatmul.mubr.bf16.vlgmr.msra.gmra.mrb[0].mxu1 %v384_v44  ;;  %v590_v44 = vld [vmem:[%s4464_s2] sm:$0xf] }
 0x14c   : > { %1740 = vmatprep.mubr.bf16.mxu0 %v391_v45  ;;  %1929 = vmatprep.mubr.bf16.mxu1 %v391_v45  ;;  %v4338_v45 = vsub.s32 1, %v593_v39  ;;  %v4341_v49 = vrot.slane %v590_v44, %v4333_v42  ;;  %v4343_v50 = vrot.slane %v590_v44, %v602_v43 }
 0x14d   : > { %2383 = vmatpush1.bf16.msra.mxu0 %v3702_v46  ;;  %2731 = vmatpush1.bf16.msra.mxu1 %v3798_v23  ;;  %v606_v46 = vsub.s32 3, %v593_v39 }
 0x14e   : > { %2384 = vmatprep.subr.bf16.mxu0 %v3707_v47  ;;  %2732 = vmatprep.subr.bf16.mxu1 %v3803_v25  ;;  %v3822_v47 = vld [vmem:[#allocation8 + $0x80] ss:$8 sps:$4 sm:$0xff]   ;;  %v4346_v51 = vrot.slane %v590_v44, %v4338_v45 }
 0x14f   : > { %v3750_v25 = vld [vmem:[#allocation7 + $0x100] ss:$8 sps:$4 sm:$0xff]  }
 0x151   : > { %2385 = vmatpush1.bf16.msra.mxu0 %v3705_v52  ;;  %2733 = vmatpush1.bf16.msra.mxu1 %v3801_v26  ;;  %v4348_v52 = vrot.slane %v590_v44, %v606_v46  ;;  %v3753_v44 = vld [vmem:[#allocation7 + $0x110] ss:$8 sps:$4 sm:$0xff]  }
 0x152   : > { %2386 = vmatprep.subr.bf16.mxu0 %v3710_v53  ;;  %2734 = vmatprep.subr.bf16.mxu1 %v3806_v27  ;;  %v3825_v53 = vld [vmem:[#allocation8 + $0x90] ss:$8 sps:$4 sm:$0xff]  }
 0x153   : > { %1741 = vmatmul.mubr.bf16.gmra.mrb[4].mxu0 %v390_v54  ;;  %1930 = vmatmul.mubr.bf16.gmra.mrb[4].mxu1 %v390_v54  ;;  %v3830_v54 = vld [vmem:[#allocation8 + $0xa4] ss:$8 sps:$4 sm:$0xff]  }
 0x154   : > { %1750 = vmatprep.mubr.bf16.mxu0 %v397_v55  ;;  %1939 = vmatprep.mubr.bf16.mxu1 %v397_v55 }
 0x155   : > { %2387 = vmatpush1.bf16.msra.mxu0 %v3708_v56  ;;  %2735 = vmatpush1.bf16.msra.mxu1 %v3804_v28 }
 0x156   : > { %2388 = vmatprep.subr.bf16.mxu0 %v3713_v57  ;;  %2736 = vmatprep.subr.bf16.mxu1 %v3809_v29 }
 0x159   : > { %2389 = vmatpush1.bf16.msra.mxu0 %v3711_v60  ;;  %2737 = vmatpush1.bf16.msra.mxu1 %v3807_v30  ;;  %v3755_v30 = vld [vmem:[#allocation7 + $0x114] ss:$8 sps:$4 sm:$0xff]  }
 0x15a   : > { %2390 = vmatprep.subr.bf16.mxu0 %v3716_v61  ;;  %2738 = vmatprep.subr.bf16.mxu1 %v3812_v31 }
 0x15b   : > { %1751 = vmatmul.mubr.bf16.gmra.mrb[8].mxu0 %v396_v62  ;;  %1940 = vmatmul.mubr.bf16.gmra.mrb[8].mxu1 %v396_v62 }
 0x15d   : > { %2391 = vmatpush1.bf16.msra.mxu0 %v3714_v63  ;;  %2739 = vmatpush1.bf16.msra.mxu1 %v3810_v32 }
 0x15e   : > { %2392 = vmatprep.subr.bf16.mxu0 %v3719_v0  ;;  %2740 = vmatprep.subr.bf16.mxu1 %v3815_v33 }
 0x161   : > { %2393 = vmatpush1.bf16.msra.mxu0 %v3717_v1  ;;  %2741 = vmatpush1.bf16.msra.mxu1 %v3813_v34  ;;  %v3828_v1 = vld [vmem:[#allocation8 + $0xa0] ss:$8 sps:$4 sm:$0xff]  }
 0x162   : > { %2394 = vmatprep.subr.bf16.mxu0 %v3722_v2  ;;  %2742 = vmatprep.subr.bf16.mxu1 %v3818_v35  ;;  %v3834_v35 = vld [vmem:[#allocation8 + $0xc0] ss:$8 sps:$4 sm:$0xff]  }
 0x165   : > { %2395 = vmatpush1.bf16.msra.mxu0 %v3720_v3  ;;  %2743 = vmatpush1.bf16.msra.mxu1 %v3816_v37 }
 0x166   : > { %2396 = vmatprep.subr.bf16.mxu0 %v3725_v4  ;;  %2744 = vmatprep.subr.bf16.mxu1 %v3821_v38 }
 0x169   : > { %2397 = vmatpush1.bf16.msra.mxu0 %v3723_v5  ;;  %2745 = vmatpush1.bf16.msra.mxu1 %v3819_v40  ;;  %v3839_v40 = vld [vmem:[#allocation8 + $0xd4] ss:$8 sps:$4 sm:$0xff]  }
 0x16a   : > { %2398 = vmatprep.subr.bf16.mxu0 %v3728_v6  ;;  %2746 = vmatprep.subr.bf16.mxu1 %v3824_v41  ;;  %v3833_v6 = vld [vmem:[#allocation8 + $0xb4] ss:$8 sps:$4 sm:$0xff]  }
 0x16d   : > { %2399 = vmatpush1.bf16.msra.mxu0 %v3726_v7  ;;  %2747 = vmatpush1.bf16.msra.mxu1 %v3822_v47 }
 0x16e   : > { %2400 = vmatprep.subr.bf16.mxu0 %v3731_v8  ;;  %2748 = vmatprep.subr.bf16.mxu1 %v3827_v48 }
 0x171   : > { %2401 = vmatpush1.bf16.msra.mxu0 %v3729_v9  ;;  %2749 = vmatpush1.bf16.msra.mxu1 %v3825_v53 }
 0x172   : > { %2402 = vmatprep.subr.bf16.mxu0 %v3734_v10  ;;  %2750 = vmatprep.subr.bf16.mxu1 %v3830_v54  ;;  %v3758_v54 = vld [vmem:[#allocation7 + $0x124] ss:$8 sps:$4 sm:$0xff]  }
 0x175   : > { %2403 = vmatpush1.bf16.msra.mxu0 %v3732_v11  ;;  %2751 = vmatpush1.bf16.msra.mxu1 %v3828_v1 }
 0x176   : > { %2404 = vmatprep.subr.bf16.mxu0 %v3737_v12  ;;  %2752 = vmatprep.subr.bf16.mxu1 %v3833_v6 }
 0x179   : > { %2405 = vmatpush1.bf16.msra.mxu0 %v3735_v13 }
 0x17a   : > { %2406 = vmatprep.subr.bf16.mxu0 %v3740_v14 }
 0x17d   : > { %2407 = vmatpush1.bf16.msra.mxu0 %v3738_v15 }
 0x17e   : > { %2408 = vmatprep.subr.bf16.mxu0 %v3743_v16 }
 0x181   : > { %2409 = vmatpush1.bf16.msra.mxu0 %v3741_v17  ;;  %v3831_v17 = vld [vmem:[#allocation8 + $0xb0] ss:$8 sps:$4 sm:$0xff]  }
 0x182   : > { %2410 = vmatprep.subr.bf16.mxu0 %v3746_v18  ;;  %2753 = vmatpush1.bf16.msra.mxu1 %v3831_v17 }
 0x185   : > { %2411 = vmatpush1.bf16.msra.mxu0 %v3744_v19 }
 0x186   : > { %2412 = vmatprep.subr.bf16.mxu0 %v3749_v20  ;;  %v3836_v20 = vld [vmem:[#allocation8 + $0xc4] ss:$8 sps:$4 sm:$0xff]  }
 0x187   : > { %2754 = vmatprep.subr.bf16.mxu1 %v3836_v20 }
 0x188   : > { %2755 = vmatpush1.bf16.msra.mxu1 %v3834_v35  ;;  %v3773_v35 = vld [vmem:[#allocation7 + $0x174] ss:$8 sps:$4 sm:$0xff]  }
 0x189   : > { %2413 = vmatpush1.bf16.msra.mxu0 %v3747_v21  ;;  %2756 = vmatprep.subr.bf16.mxu1 %v3839_v40  ;;  %v3777_v40 = vld [vmem:[#allocation7 + $0x190] ss:$8 sps:$4 sm:$0xff]  }
 0x18a   : > { %2445 = vmatprep.subr.bf16.mxu0 %v3752_v22 }
 0x21e   : > { %v1732_v55 = vpop.f32.mrb[0].mxu0  ;;  %v1921_v56 = vpop.f32.mrb[0].mxu1 }
 0x21f   : > { %v3228_v57 = vadd.f32 %v1732_v55, %v4341_v49  ;;  %v3240_v58 = vadd.f32 %v1921_v56, %v4343_v50  ;;  %v1734_v59 = vpop.f32.mrb[1].mxu0  ;;  %v1923_v60 = vpop.f32.mrb[1].mxu1 }
 0x220   : > { %v3229_v61 = vadd.f32 %v1734_v59, %v4346_v51  ;;  %v3241_v62 = vadd.f32 %v1923_v60, %v4348_v52  ;;  %v1736_v63 = vpop.f32.mrb[2].mxu0  ;;  %v1925_v0 = vpop.f32.mrb[2].mxu1  ;;  %v3837_v59 = vld [vmem:[#allocation8 + $0xd0] ss:$8 sps:$4 sm:$0xff]  }
 0x221   : > { %v3230_v2 = vadd.f32 %v1736_v63, %v4341_v49  ;;  %v3242_v3 = vadd.f32 %v1925_v0, %v4343_v50  ;;  %v1738_v4 = vpop.f32.mrb[3].mxu0  ;;  %v1927_v5 = vpop.f32.mrb[3].mxu1  ;;  %v1950_v9 = vmax.f32 %v3228_v57, 0.0  ;;  %v1952_v10 = vmax.f32 %v3240_v58, 0.0  ;;  %2757 = vmatpush1.bf16.msra.mxu1 %v3837_v59  ;;  %v3840_v59 = vld [vmem:[#allocation8 + $0xe0] ss:$8 sps:$4 sm:$0xff]  }
 0x222   : > { %v3231_v7 = vadd.f32 %v1738_v4, %v4346_v51  ;;  %v3243_v8 = vadd.f32 %v1927_v5, %v4348_v52  ;;  %v1951_v13 = vmax.f32 %v3229_v61, 0.0  ;;  %v1953_v14 = vmax.f32 %v3241_v62, 0.0 }
 0x223   : > { %v1954_v11 = vmax.f32 %v3230_v2, 0.0  ;;  %v1956_v12 = vmax.f32 %v3242_v3, 0.0  ;;  %v3756_v2 = vld [vmem:[#allocation7 + $0x120] ss:$8 sps:$4 sm:$0xff]  }
 0x224   : > { %v1955_v15 = vmax.f32 %v3231_v7, 0.0  ;;  %v1957_v16 = vmax.f32 %v3243_v8, 0.0  ;;  %v3761_v7 = vld [vmem:[#allocation7 + $0x134] ss:$8 sps:$4 sm:$0xff]  }
 0x225   : > { %v1974_v18 = vpack.c.bf16 %v1954_v11, %v1950_v9  ;;  %v4358_v19 = vpack.c.bf16 %v1956_v12, %v1952_v10 }
 0x226   : > { %v1975_v21 = vpack.c.bf16 %v1955_v15, %v1951_v13  ;;  %v4360_v22 = vpack.c.bf16 %v1957_v16, %v1953_v14  ;;  %v1742_v23 = vpop.f32.mrb[4].mxu0  ;;  %v1931_v24 = vpop.f32.mrb[4].mxu1 }
 0x227   : > { %v3232_v26 = vadd.f32 %v1742_v23, %v4341_v49  ;;  %v3244_v27 = vadd.f32 %v1931_v24, %v4343_v50  ;;  %v1744_v28 = vpop.f32.mrb[5].mxu0  ;;  %v1933_v29 = vpop.f32.mrb[5].mxu1 }
 0x228   : > { %v3233_v31 = vadd.f32 %v1744_v28, %v4346_v51  ;;  %v3245_v32 = vadd.f32 %v1933_v29, %v4348_v52  ;;  %v1746_v33 = vpop.f32.mrb[6].mxu0  ;;  %v1935_v34 = vpop.f32.mrb[6].mxu1  ;;  %2414 = vmatprep.mubr.bf16.mxu0 %v1975_v21 }
 0x229   : > { %v3234_v36 = vadd.f32 %v1746_v33, %v4341_v49  ;;  %v3246_v37 = vadd.f32 %v1935_v34, %v4343_v50  ;;  %v1748_v38 = vpop.f32.mrb[7].mxu0  ;;  %v1937_v39 = vpop.f32.mrb[7].mxu1  ;;  %2415 = vmatmul.mubr.bf16.vlgmr.msra.gmra.mrb[12].mxu0 %v1974_v18  ;;  %v1958_v46 = vmax.f32 %v3232_v26, 0.0  ;;  %v1960_v47 = vmax.f32 %v3244_v27, 0.0  ;;  %v3759_v18 = vld [vmem:[#allocation7 + $0x130] ss:$8 sps:$4 sm:$0xff]  }
 0x22a   : > { %v3235_v41 = vadd.f32 %v1748_v38, %v4346_v51  ;;  %v3247_v43 = vadd.f32 %v1937_v39, %v4348_v52  ;;  %2446 = vmatpush1.bf16.msra.mxu0 %v3750_v25  ;;  %v1959_v55 = vmax.f32 %v3233_v31, 0.0  ;;  %v1961_v56 = vmax.f32 %v3245_v32, 0.0  ;;  %v3764_v25 = vld [vmem:[#allocation7 + $0x144] ss:$8 sps:$4 sm:$0xff]   ;;  %v3765_v32 = vld [vmem:[#allocation7 + $0x150] ss:$8 sps:$4 sm:$0xff]  }
 0x22b   : > { %v1962_v48 = vmax.f32 %v3234_v36, 0.0  ;;  %v1964_v53 = vmax.f32 %v3246_v37, 0.0  ;;  %2447 = vmatprep.subr.bf16.mxu0 %v3755_v30  ;;  %v3770_v33 = vld [vmem:[#allocation7 + $0x164] ss:$8 sps:$4 sm:$0xff]   ;;  %v3768_v34 = vld [vmem:[#allocation7 + $0x160] ss:$8 sps:$4 sm:$0xff]  }
 0x22c   : > { %v1963_v57 = vmax.f32 %v3235_v41, 0.0  ;;  %v1965_v58 = vmax.f32 %v3247_v43, 0.0  ;;  %v3771_v36 = vld [vmem:[#allocation7 + $0x170] ss:$8 sps:$4 sm:$0xff]   ;;  %v3776_v37 = vld [vmem:[#allocation7 + $0x184] ss:$8 sps:$4 sm:$0xff]  }
 0x22d   : > { %v1978_v60 = vpack.c.bf16 %v1962_v48, %v1958_v46  ;;  %v4370_v61 = vpack.c.bf16 %v1964_v53, %v1960_v47  ;;  %v3774_v38 = vld [vmem:[#allocation7 + $0x180] ss:$8 sps:$4 sm:$0xff]   ;;  %v3779_v39 = vld [vmem:[#allocation7 + $0x194] ss:$8 sps:$4 sm:$0xff]   ;;  %v3782_v41 = vld [vmem:[#allocation7 + $0x1a4] ss:$8 sps:$4 sm:$0xff]  }
 0x22e   : > { %v1979_v62 = vpack.c.bf16 %v1963_v57, %v1959_v55  ;;  %v4372_v63 = vpack.c.bf16 %v1965_v58, %v1961_v56  ;;  %2448 = vmatpush1.bf16.msra.mxu0 %v3753_v44  ;;  %v1752_v0 = vpop.f32.mrb[8].mxu0  ;;  %v1941_v1 = vpop.f32.mrb[8].mxu1  ;;  %v3785_v43 = vld [vmem:[#allocation7 + $0x1b4] ss:$8 sps:$4 sm:$0xff]   ;;  %v3783_v44 = vld [vmem:[#allocation7 + $0x1b0] ss:$8 sps:$4 sm:$0xff]  }
 0x22f   : > { %v3236_v3 = vadd.f32 %v1752_v0, %v4341_v49  ;;  %v3248_v4 = vadd.f32 %v1941_v1, %v4343_v50  ;;  %v1754_v5 = vpop.f32.mrb[9].mxu0  ;;  %v1943_v6 = vpop.f32.mrb[9].mxu1  ;;  %2449 = vmatprep.subr.bf16.mxu0 %v3758_v54  ;;  %v3788_v46 = vld [vmem:[#allocation7 + $0x1c4] ss:$8 sps:$4 sm:$0xff]   ;;  %v3786_v47 = vld [vmem:[#allocation7 + $0x1c0] ss:$8 sps:$4 sm:$0xff]  }
 0x230   : > { %v3237_v8 = vadd.f32 %v1754_v5, %v4346_v51  ;;  %v3249_v9 = vadd.f32 %v1943_v6, %v4348_v52  ;;  %v1756_v10 = vpop.f32.mrb[10].mxu0  ;;  %v1945_v11 = vpop.f32.mrb[10].mxu1  ;;  %2424 = vmatprep.mubr.bf16.mxu0 %v1979_v62  ;;  %v3791_v48 = vld [vmem:[#allocation7 + $0x1d4] ss:$8 sps:$4 sm:$0xff]   ;;  %v3789_v53 = vld [vmem:[#allocation7 + $0x1d0] ss:$8 sps:$4 sm:$0xff]  }
 0x231   : > { %v3238_v12 = vadd.f32 %v1756_v10, %v4341_v49  ;;  %v3250_v13 = vadd.f32 %v1945_v11, %v4343_v50  ;;  %v1758_v14 = vpop.f32.mrb[11].mxu0  ;;  %v1947_v15 = vpop.f32.mrb[11].mxu1  ;;  %2425 = vmatmul.mubr.bf16.gmra.mrb[16].mxu0 %v1978_v60  ;;  %v1966_v20 = vmax.f32 %v3236_v3, 0.0  ;;  %v1968_v21 = vmax.f32 %v3248_v4, 0.0  ;;  %v3794_v54 = vld [vmem:[#allocation7 + $0x1e4] ss:$8 sps:$4 sm:$0xff]  }
 0x232   : > { %v3239_v16 = vadd.f32 %v1758_v14, %v4346_v51  ;;  %v3251_v17 = vadd.f32 %v1947_v15, %v4348_v52  ;;  %2450 = vmatpush1.bf16.msra.mxu0 %v3756_v2  ;;  %v1967_v26 = vmax.f32 %v3237_v8, 0.0  ;;  %v1969_v27 = vmax.f32 %v3249_v9, 0.0  ;;  %v3762_v51 = vld [vmem:[#allocation7 + $0x140] ss:$8 sps:$4 sm:$0xff]   ;;  %v3767_v52 = vld [vmem:[#allocation7 + $0x154] ss:$8 sps:$4 sm:$0xff]  }
 0x233   : > { %v1970_v23 = vmax.f32 %v3238_v12, 0.0  ;;  %v1972_v24 = vmax.f32 %v3250_v13, 0.0  ;;  %2451 = vmatprep.subr.bf16.mxu0 %v3761_v7  ;;  %v3792_v55 = vld [vmem:[#allocation7 + $0x1e0] ss:$8 sps:$4 sm:$0xff]   ;;  %v3797_v56 = vld [vmem:[#allocation7 + $0x1f4] ss:$8 sps:$4 sm:$0xff]  }
 0x234   : > { %v1971_v49 = vmax.f32 %v3239_v16, 0.0  ;;  %v1973_v28 = vmax.f32 %v3251_v17, 0.0  ;;  %v3795_v57 = vld [vmem:[#allocation7 + $0x1f0] ss:$8 sps:$4 sm:$0xff]   ;;  %v3842_v58 = vld [vmem:[#allocation8 + $0xe4] ss:$8 sps:$4 sm:$0xff]  }
 0x235   : > { %v1982_v50 = vpack.c.bf16 %v1970_v23, %v1966_v20  ;;  %v1984_v29 = vpack.c.bf16 %v1972_v24, %v1968_v21  ;;  %2758 = vmatprep.subr.bf16.mxu1 %v3842_v58  ;;  %v3845_v60 = vld [vmem:[#allocation8 + $0xf4] ss:$8 sps:$4 sm:$0xff]   ;;  %v3843_v62 = vld [vmem:[#allocation8 + $0xf0] ss:$8 sps:$4 sm:$0xff]   ;;  %v2050_v0 = vld [vmem:[%s4466_s4] sm:$0x3] }
 0x236   : > { %v1983_v30 = vpack.c.bf16 %v1971_v49, %v1967_v26  ;;  %v1985_v31 = vpack.c.bf16 %v1973_v28, %v1969_v27  ;;  %2452 = vmatpush1.bf16.msra.mxu0 %v3759_v18  ;;  %2759 = vmatpush1.bf16.msra.mxu1 %v3840_v59 }
 0x237   : > { %2453 = vmatprep.subr.bf16.mxu0 %v3764_v25  ;;  %2760 = vmatprep.subr.bf16.mxu1 %v3845_v60 }
 0x238   : > { %2434 = vmatprep.mubr.bf16.mxu0 %v1983_v30 }
 0x239   : > { %2435 = vmatmul.mubr.bf16.gmra.mrb[20].mxu0 %v1982_v50 }
 0x23a   : > { %2454 = vmatpush1.bf16.msra.mxu0 %v3762_v51  ;;  %2477 = vmatprep.mubr.bf16.mxu0 %v4360_v22  ;;  %v3780_v22 = vld [vmem:[#allocation7 + $0x1a0] ss:$8 sps:$4 sm:$0xff]  }
 0x23b   : > { %2455 = vmatprep.subr.bf16.mxu0 %v3767_v52  ;;  %2761 = vmatpush1.bf16.msra.mxu1 %v3843_v62 }
 0x23e   : > { %2456 = vmatpush1.bf16.msra.mxu0 %v3765_v32 }
 0x23f   : > { %2457 = vmatprep.subr.bf16.mxu0 %v3770_v33 }
 0x242   : > { %2458 = vmatpush1.bf16.msra.mxu0 %v3768_v34 }
 0x243   : > { %2459 = vmatprep.subr.bf16.mxu0 %v3773_v35 }
 0x246   : > { %2460 = vmatpush1.bf16.msra.mxu0 %v3771_v36 }
 0x247   : > { %2461 = vmatprep.subr.bf16.mxu0 %v3776_v37 }
 0x24a   : > { %2462 = vmatpush1.bf16.msra.mxu0 %v3774_v38 }
 0x24b   : > { %2463 = vmatprep.subr.bf16.mxu0 %v3779_v39 }
 0x24e   : > { %2464 = vmatpush1.bf16.msra.mxu0 %v3777_v40  ;;  %v2558_v40 = vld [vmem:[%s4468_s6] sm:$0x3] }
 0x24f   : > { %2465 = vmatprep.subr.bf16.mxu0 %v3782_v41  ;;  %v2563_v41 = vrot.slane %v2558_v40, %v4333_v42 }
 0x252   : > { %2466 = vmatpush1.bf16.msra.mxu0 %v3780_v22  ;;  %v2567_v22 = vrot.slane %v2558_v40, %v4338_v45 }
 0x253   : > { %2467 = vmatprep.subr.bf16.mxu0 %v3785_v43 }
 0x256   : > { %2468 = vmatpush1.bf16.msra.mxu0 %v3783_v44 }
 0x257   : > { %2469 = vmatprep.subr.bf16.mxu0 %v3788_v46 }
 0x25a   : > { %2470 = vmatpush1.bf16.msra.mxu0 %v3786_v47 }
 0x25b   : > { %2471 = vmatprep.subr.bf16.mxu0 %v3791_v48 }
 0x25e   : > { %2472 = vmatpush1.bf16.msra.mxu0 %v3789_v53 }
 0x25f   : > { %2473 = vmatprep.subr.bf16.mxu0 %v3794_v54 }
 0x262   : > { %2474 = vmatpush1.bf16.msra.mxu0 %v3792_v55 }
 0x263   : > { %2475 = vmatprep.subr.bf16.mxu0 %v3797_v56 }
 0x266   : > { %2476 = vmatpush1.bf16.msra.mxu0 %v3795_v57 }
 0x269   : > { %2478 = vmatmul.mubr.bf16.vlgmr.msra.gmra.mrb[12].mxu0 %v4358_v19  ;;  %v2055_v19 = vrot.slane %v2050_v0, %v4333_v42 }
 0x26a   : > { %2487 = vmatprep.mubr.bf16.mxu0 %v4372_v63  ;;  %v2059_v63 = vrot.slane %v2050_v0, %v4338_v45 }
 0x271   : > { %2488 = vmatmul.mubr.bf16.gmra.mrb[16].mxu0 %v4370_v61 }
 0x272   : > { %2497 = vmatprep.mubr.bf16.mxu0 %v1985_v31 }
 0x279   : > { %2498 = vmatmul.mubr.bf16.gmra.mrb[20].mxu0 %v1984_v29 }
 0x33c   : > { %v2479_v1 = vpop.f32.mrb[12].mxu0 }
 0x33d   : > { %v3252_v61 = vadd.f32 %v2479_v1, %v2055_v19  ;;  %v2481_v2 = vpop.f32.mrb[13].mxu0 }
 0x33e   : > { %v3253_v3 = vadd.f32 %v2481_v2, %v2059_v63  ;;  %v2483_v4 = vpop.f32.mrb[14].mxu0 }
 0x33f   : > { %v3254_v5 = vadd.f32 %v2483_v4, %v2055_v19  ;;  %v2485_v6 = vpop.f32.mrb[15].mxu0  ;;  %v2508_v8 = vmax.f32 %v3252_v61, 0.0 }
 0x340   : > { %v3255_v7 = vadd.f32 %v2485_v6, %v2059_v63  ;;  %v2509_v10 = vmax.f32 %v3253_v3, 0.0 }
 0x341   : > { %v2510_v9 = vmax.f32 %v3254_v5, 0.0 }
 0x342   : > { %v2511_v11 = vmax.f32 %v3255_v7, 0.0 }
 0x343   : > { %v2520_v12 = vpack.c.bf16 %v2510_v9, %v2508_v8 }
 0x344   : > { %v2521_v13 = vpack.c.bf16 %v2511_v11, %v2509_v10  ;;  %v2489_v14 = vpop.f32.mrb[16].mxu0 }
 0x345   : > { %v3256_v15 = vadd.f32 %v2489_v14, %v2055_v19  ;;  %v2491_v16 = vpop.f32.mrb[17].mxu0 }
 0x346   : > { %v3257_v17 = vadd.f32 %v2491_v16, %v2059_v63  ;;  %v2493_v18 = vpop.f32.mrb[18].mxu0  ;;  %2762 = vmatprep.mubr.bf16.mxu1 %v2521_v13 }
 0x347   : > { %v3258_v20 = vadd.f32 %v2493_v18, %v2055_v19  ;;  %v2495_v21 = vpop.f32.mrb[19].mxu0  ;;  %2763 = vmatmul.mubr.bf16.vlgmr.msra.gmra.mrb[12].mxu1 %v2520_v12  ;;  %v2512_v24 = vmax.f32 %v3256_v15, 0.0 }
 0x348   : > { %v3259_v23 = vadd.f32 %v2495_v21, %v2059_v63  ;;  %v2513_v26 = vmax.f32 %v3257_v17, 0.0 }
 0x349   : > { %v2514_v25 = vmax.f32 %v3258_v20, 0.0 }
 0x34a   : > { %v2515_v27 = vmax.f32 %v3259_v23, 0.0 }
 0x34b   : > { %v2522_v49 = vpack.c.bf16 %v2514_v25, %v2512_v24 }
 0x34c   : > { %v2523_v28 = vpack.c.bf16 %v2515_v27, %v2513_v26  ;;  %v2499_v50 = vpop.f32.mrb[20].mxu0 }
 0x34d   : > { %v3260_v29 = vadd.f32 %v2499_v50, %v2055_v19  ;;  %v2501_v30 = vpop.f32.mrb[21].mxu0 }
 0x34e   : > { %v3261_v31 = vadd.f32 %v2501_v30, %v2059_v63  ;;  %v2503_v51 = vpop.f32.mrb[22].mxu0  ;;  %2772 = vmatprep.mubr.bf16.mxu1 %v2523_v28 }
 0x34f   : > { %v3262_v52 = vadd.f32 %v2503_v51, %v2055_v19  ;;  %v2505_v32 = vpop.f32.mrb[23].mxu0  ;;  %2773 = vmatmul.mubr.bf16.gmra.mrb[16].mxu1 %v2522_v49  ;;  %v2516_v34 = vmax.f32 %v3260_v29, 0.0 }
 0x350   : > { %v3263_v33 = vadd.f32 %v2505_v32, %v2059_v63  ;;  %v2517_v36 = vmax.f32 %v3261_v31, 0.0 }
 0x351   : > { %v2518_v35 = vmax.f32 %v3262_v52, 0.0 }
 0x352   : > { %v2519_v37 = vmax.f32 %v3263_v33, 0.0 }
 0x353   : > { %v2524_v38 = vpack.c.bf16 %v2518_v35, %v2516_v34 }
 0x354   : > { %v2525_v39 = vpack.c.bf16 %v2519_v37, %v2517_v36 }
 0x356   : > { %2782 = vmatprep.mubr.bf16.mxu1 %v2525_v39 }
 0x357   : > { %2783 = vmatmul.mubr.bf16.gmra.mrb[20].mxu1 %v2524_v38 }
 0x41a   : > { %v2764_v43 = vpop.f32.mrb[12].mxu1 }
 0x41b   : > { %v2765_v44 = vadd.f32 %v2764_v43, %v2563_v41  ;;  %v2766_v46 = vpop.f32.mrb[13].mxu1 }
 0x41c   : > { %v2767_v47 = vadd.f32 %v2766_v46, %v2567_v22  ;;  %v2768_v48 = vpop.f32.mrb[14].mxu1 }
 0x41d   : > { %2793 = vst [vmem:[%s4397_s11] sm:$0xff] %v2765_v44  ;;  %v2769_v53 = vadd.f32 %v2768_v48, %v2563_v41  ;;  %v2770_v54 = vpop.f32.mrb[15].mxu1 }
 0x41e   : > { %2794 = vst [vmem:[%s4397_s11 + $0x8] sm:$0xff] %v2767_v47  ;;  %v2771_v42 = vadd.f32 %v2770_v54, %v2567_v22 }
 0x41f   : > { %2795 = vst [vmem:[%s4397_s11 + $0x10] sm:$0xff] %v2769_v53 }
 0x420   : > { %2796 = vst [vmem:[%s4397_s11 + $0x18] sm:$0xff] %v2771_v42 }
 0x422   : > { %v2774_v45 = vpop.f32.mrb[16].mxu1 }
 0x423   : > { %v2775_v55 = vadd.f32 %v2774_v45, %v2563_v41  ;;  %v2776_v56 = vpop.f32.mrb[17].mxu1 }
 0x424   : > { %v2777_v57 = vadd.f32 %v2776_v56, %v2567_v22  ;;  %v2778_v58 = vpop.f32.mrb[18].mxu1 }
 0x425   : > { %2797 = vst [vmem:[%s4397_s11 + $0x20] sm:$0xff] %v2775_v55  ;;  %v2779_v59 = vadd.f32 %v2778_v58, %v2563_v41  ;;  %v2780_v60 = vpop.f32.mrb[19].mxu1 }
 0x426   : > { %2798 = vst [vmem:[%s4397_s11 + $0x28] sm:$0xff] %v2777_v57  ;;  %v2781_v62 = vadd.f32 %v2780_v60, %v2567_v22 }
 0x427   : > { %2799 = vst [vmem:[%s4397_s11 + $0x30] sm:$0xff] %v2779_v59 }
 0x428   : > { %2800 = vst [vmem:[%s4397_s11 + $0x38] sm:$0xff] %v2781_v62 }
 0x42a   : > { %v2784_v0 = vpop.f32.mrb[20].mxu1 }
 0x42b   : > { %v2785_v19 = vadd.f32 %v2784_v0, %v2563_v41  ;;  %v2786_v63 = vpop.f32.mrb[21].mxu1 }
 0x42c   : > { %v2787_v1 = vadd.f32 %v2786_v63, %v2567_v22  ;;  %v2788_v61 = vpop.f32.mrb[22].mxu1 }
 0x42d   : > { %2801 = vst [vmem:[%s4397_s11 + $0x40] sm:$0xff] %v2785_v19  ;;  %v2789_v2 = vadd.f32 %v2788_v61, %v2563_v41  ;;  %v2790_v3 = vpop.f32.mrb[23].mxu1 }
 0x42e   : > { %2802 = vst [vmem:[%s4397_s11 + $0x48] sm:$0xff] %v2787_v1  ;;  %v2791_v4 = vadd.f32 %v2790_v3, %v2567_v22 }
 0x42f   : > { %2803 = vst [vmem:[%s4397_s11 + $0x50] sm:$0xff] %v2789_v2 }
 0x430   : > { %2804 = vst [vmem:[%s4397_s11 + $0x58] sm:$0xff] %v2791_v4 }
 0x431   : > { %3973 = shalt.err (!%p3970_p4)
}
 0x432   : > { %s3974_s23 = scalar_lea.hbm %s4413_s22, 1536  ;;  %s3978_s21 = scalar_lea.hbm %s4469_s7, 3072 }
 0x433   : > { %p3975_p9 = scmp.ne.s32.totalorder %s4413_s22, %s3974_s23  ;;  %p3979_p8 = scmp.lt.u32.totalorder %s4413_s22, %s4469_s7 }
 0x434   : > { %p3980_p13 = scmp.lt.u32.totalorder %s3978_s21, %s3974_s23  ;;  %p3982_p3 = scmp.lt.u32.totalorder %s3974_s23, %s4413_s22 }
 0x435   : > { %p3976_p0 = pnand %p3975_p9, %p4227_p10 }
 0x436   : > { %p3981_p6 = por %p3980_p13, %p3979_p8 }
 0x437   : > { %p3977_p11 = pneg %p3976_p0 }
 0x438   : > { %p3983_p5 = por %p3982_p3, %p3981_p6 }
 0x43a   : > { %p3984_p7 = pnand %p3983_p5, %p3977_p11 }
 0x43c   : > { %3987 = shalt.err (!%p3984_p7)
}
 0x43d   : > { %s4047_s12 = smov 256   ;;  %s4048_s17 = smov 16  }
 0x43e   : > { %3342 = dma.vmem_to_hbm [thread:$0]  (%p4227_p10), %s4415_s15, 1536, %s4413_s22, %s2806_s28, %s4047_s12, %s4047_s12, %s4048_s17  }
 0x43f PF: > { %s2835_s19 = sand.u32 1, %s4022_s24   ;;  %p4489_p12 = scmp.ne.s32.totalorder %s4475_s8, 0 }
 0x440   : > { %p4490_p2 = scmp.ge.s32.totalorder %s4034_s27, 2  ;;  %s2836_s30 = scalar_lea.sflag [#allocation4], %s2835_s19 }
 0x442   : > { %p3359_p1 = pnand %p4490_p2, %p4489_p12 }
 0x444   : > { %4017 = dma.done.wait (!%p3359_p1), %s2836_s30, 1536  }
 0x445   : > { %4019 = vsyncadd (!%p3359_p1), %s2836_s30, 4294965760  ;;  %p22_p4 = scmp.ge.s32.totalorder %s4217_s1, 4   ;;  %s4491_s24 = smov %s4026_s25 }
 0x446   : > { %s4492_s25 = smov %s4030_s26  ;;  %s4493_s26 = smov %s4233_s18 }
 0x447   : > { %s4494_s27 = smov %s4217_s1  ;;  %24 = sbr.rel (!%p22_p4) target bundleno = 9 (0x9), region = 105 }
 0x44e   :  { %2841 = vsyncpa [#allocation3], 1 }
 0x44f   :  { %2843 = vsyncpa [#allocation3 + $0x1], 1 }
 0x450   :  { %2844 = vsyncpa [#allocation6], 1 }
 0x451   :  { %2845 = vsyncpa [#allocation9], 1 }
 0x452   :  { %2846 = vsyncpa [#allocation4], 1 }
 0x453   :  { %2848 = vsyncpa [#allocation4 + $0x1], 1 }

</bundles_post_ra>
